<compile_context>
chip_gen: v7x
topology: tpu7x:2x2x1
jax: 0.10.0
libtpu: 0.0.40
codegen_flags: <defaults>
</compile_context>

<pallas_src>
import numpy as np
import jax
import jax.numpy as jnp
from jax import lax, random
from jax.experimental import pallas as pl
from jax.experimental.pallas import tpu as pltpu

# Hyperparameters = PyTorch module defaults.
KLINE_DIM = 5
REPORT_DIM = 768
HIDDEN_DIM = 256
NUM_LAYERS = 4
NUM_HEADS = 1          # single head -> head_dim == d_model
LN_EPS = 1e-5

# Row layout of the packed per-layer parameter container (L, 32, 256).
_R_WQKV = 0            # rows  0..4 : Wqkv (D x 3D), lanes 0..14
_R_WO = 5              # rows  5..9 : Wo   (D x D),  lanes 0..4
_R_W1 = 10             # rows 10..14: W1   (D x H)
_R_W2T = 15            # rows 15..19: W2^T (D x H)  == torch lin2_w, lane-dense
_R_BQKV = 20
_R_BO = 21
_R_B1 = 22
_R_B2 = 23
_R_G1 = 24
_R_BE1 = 25
_R_G2 = 26
_R_BE2 = 27
PACK_ROWS = 32


def _layer_norm(x, gamma, beta):
    mu = jnp.mean(x, axis=-1, keepdims=True)
    xc = x - mu
    var = jnp.mean(xc * xc, axis=-1, keepdims=True)
    return xc * lax.rsqrt(var + LN_EPS) * gamma + beta


# ---------------------------------------------------------------------------
# Pallas kernel: single grid step, one (B, 5) slab (the only slab the head reads).
# ---------------------------------------------------------------------------
def _mm_transformer_kernel(x_ref, rep_ref, lp_ref, head_ref, out_ref):
    D = KLINE_DIM
    scale = 1.0 / (D ** 0.5)

    x = x_ref[...]                                        # (B, 5) f32
    for l in range(NUM_LAYERS):                           # statically unrolled
        lp = lp_ref[l]                                    # (32, 256) packed params
        wqkv = lp[_R_WQKV:_R_WQKV + D, 0:3 * D]           # (5, 15)
        wo = lp[_R_WO:_R_WO + D, 0:D]                     # (5, 5)
        w1 = lp[_R_W1:_R_W1 + D, :]                       # (5, 256)
        w2t = lp[_R_W2T:_R_W2T + D, :]                    # (5, 256) lane-dense
        bqkv = lp[_R_BQKV, 0:3 * D]
        bo = lp[_R_BO, 0:D]
        b1 = lp[_R_B1, :]
        b2 = lp[_R_B2, 0:D]
        g1, be1 = lp[_R_G1, 0:D], lp[_R_BE1, 0:D]
        g2, be2 = lp[_R_G2, 0:D], lp[_R_BE2, 0:D]

        # --- self attention (fused QKV; dropout = eval-mode identity) ---
        qkv = jnp.dot(x, wqkv, preferred_element_type=jnp.float32) + bqkv
        q, k, v = qkv[:, 0:D], qkv[:, D:2 * D], qkv[:, 2 * D:3 * D]
        sc = lax.dot_general(q, k, (((1,), (1,)), ((), ())),
                             preferred_element_type=jnp.float32) * scale
        sc = sc - jnp.max(sc, axis=-1, keepdims=True)
        p = jnp.exp(sc)
        p = p / jnp.sum(p, axis=-1, keepdims=True)
        ctx = jnp.dot(p, v, preferred_element_type=jnp.float32)
        attn = jnp.dot(ctx, wo, preferred_element_type=jnp.float32) + bo
        x = _layer_norm(x + attn, g1, be1)

        # --- feed forward (ReLU); W2 consumed lane-dense via (1,1) contraction ---
        h = jnp.maximum(
            jnp.dot(x, w1, preferred_element_type=jnp.float32) + b1, 0.0)
        ff = lax.dot_general(h, w2t, (((1,), (1,)), ((), ())),
                             preferred_element_type=jnp.float32) + b2
        x = _layer_norm(x + ff, g2, be2)

    # --- folded head: logit^T = fck . x^T + W_rep . report^T + b_all ---
    head = head_ref[...]                                  # (2, 768)
    w_rep = head[0:1, :]                                  # (1, 768)
    fck = head[1:2, 0:D]                                  # (1, 5)
    b_all = head[1:2, D:D + 1]                            # (1, 1)
    logit = (lax.dot_general(fck, x, (((1,), (1,)), ((), ())),
                             preferred_element_type=jnp.float32)
             + lax.dot_general(w_rep, rep_ref[...], (((1,), (1,)), ((), ())),
                               preferred_element_type=jnp.float32)
             + b_all)                                     # (1, B) lane-dense
    out_ref[...] = jax.nn.sigmoid(logit).astype(out_ref.dtype)


# ---------------------------------------------------------------------------
# Wrapper
# ---------------------------------------------------------------------------
def multimodal_transformer_forward(kline, report, kernel_params):
    B, S, D = kline.shape
    assert D == KLINE_DIM
    # Only the dim-1 index S-1 slab ever reaches the output (batch_first=False:
    # attention mixes over dim 0 within each dim-1 index, head takes [:, -1, :]).
    x_last = kline[:, -1, :].astype(jnp.float32)                  # (B, 5)
    rep2 = report.reshape(B, REPORT_DIM).astype(jnp.float32)      # squeeze(1)
    lp, head = kernel_params

    out_t = pl.pallas_call(
        _mm_transformer_kernel,
        out_shape=jax.ShapeDtypeStruct((1, B), jnp.float32),      # lane-dense
        grid_spec=pltpu.PrefetchScalarGridSpec(
            num_scalar_prefetch=0,
            grid=(1,),
            in_specs=[
                pl.BlockSpec((B, KLINE_DIM), lambda i: (0, 0)),
                pl.BlockSpec((B, REPORT_DIM), lambda i: (0, 0)),
                pl.BlockSpec((NUM_LAYERS, PACK_ROWS, HIDDEN_DIM),
                             lambda i: (0, 0, 0)),
                pl.BlockSpec((2, REPORT_DIM), lambda i: (0, 0)),
            ],
            out_specs=pl.BlockSpec((1, B), lambda i: (0, 0)),
        ),
        compiler_params=pltpu.CompilerParams(
            dimension_semantics=("arbitrary",)),
    )(x_last, rep2, lp, head)
    return out_t.T                                                # (B, 1)


# ---------------------------------------------------------------------------
# Deterministic parameter init (PyTorch parameter shapes), then kernel prep.
# ---------------------------------------------------------------------------
def init_torch_params(key):
    D, H, R, L, FF = KLINE_DIM, HIDDEN_DIM, REPORT_DIM, NUM_LAYERS, HIDDEN_DIM
    ks = random.split(key, 12)

    def nrm(k, shape, scale):
        return (scale * random.normal(k, shape)).astype(jnp.float32)

    return dict(
        in_proj_w=nrm(ks[0], (L, 3 * D, D), 0.4),
        in_proj_b=nrm(ks[1], (L, 3 * D), 0.1),
        out_proj_w=nrm(ks[2], (L, D, D), 0.4),
        out_proj_b=nrm(ks[3], (L, D), 0.1),
        lin1_w=nrm(ks[4], (L, FF, D), 0.4),
        lin1_b=nrm(ks[5], (L, FF), 0.1),
        lin2_w=nrm(ks[6], (L, D, FF), 0.06),
        lin2_b=nrm(ks[7], (L, D), 0.1),
        ln1_g=jnp.ones((L, D), jnp.float32),
        ln1_b=jnp.zeros((L, D), jnp.float32),
        ln2_g=jnp.ones((L, D), jnp.float32),
        ln2_b=jnp.zeros((L, D), jnp.float32),
        report_fc_w=nrm(ks[8], (H, R), 0.04),
        report_fc_b=nrm(ks[9], (H,), 0.1),
        fc_w=nrm(ks[10], (1, D + H), 0.06),
        fc_b=nrm(ks[11], (1,), 0.1),
    )


def prep_kernel_params(p):
    D, H, L, R = KLINE_DIM, HIDDEN_DIM, NUM_LAYERS, REPORT_DIM

    def pad_lanes(a):                       # (..., c) -> (..., H), zero-padded
        return jnp.pad(a, [(0, 0)] * (a.ndim - 1) + [(0, H - a.shape[-1])])

    wqkv = jnp.transpose(p["in_proj_w"], (0, 2, 1))        # (L, D, 3D) cols q|k|v
    wo = jnp.transpose(p["out_proj_w"], (0, 2, 1))         # (L, D, D)
    w1 = jnp.transpose(p["lin1_w"], (0, 2, 1))             # (L, D, H)
    w2t = p["lin2_w"]                                      # (L, D, H) lane-dense

    def vrow(v):                            # (L, n) -> (L, 1, H)
        return pad_lanes(v)[:, None, :]

    lp = jnp.concatenate([
        pad_lanes(wqkv),                    # rows  0..4
        pad_lanes(wo),                      # rows  5..9
        w1,                                 # rows 10..14
        w2t,                                # rows 15..19
        vrow(p["in_proj_b"]),               # row 20
        vrow(p["out_proj_b"]),              # row 21
        p["lin1_b"][:, None, :],            # row 22
        vrow(p["lin2_b"]),                  # row 23
        vrow(p["ln1_g"]),                   # row 24
        vrow(p["ln1_b"]),                   # row 25
        vrow(p["ln2_g"]),                   # row 26
        vrow(p["ln2_b"]),                   # row 27
        jnp.zeros((L, PACK_ROWS - 28, H), jnp.float32),     # pad to 32 rows
    ], axis=1)                                              # (L, 32, 256)

    # Folded report/head path (no nonlinearity between report_fc and fc):
    #   logit = kline_out @ fc_w[:, :D].T + report @ W_rep.T + b_all
    fc_k = p["fc_w"][:, :D]                                 # (1, 5)
    fc_r = p["fc_w"][:, D:]                                 # (1, 256)
    w_rep = fc_r @ p["report_fc_w"]                         # (1, 768)
    b_all = fc_r @ p["report_fc_b"] + p["fc_b"]             # (1,)
    head_row1 = jnp.zeros((1, R), jnp.float32)
    head_row1 = head_row1.at[0, :D].set(fc_k[0])
    head_row1 = head_row1.at[0, D].set(b_all[0])
    head = jnp.concatenate([w_rep, head_row1], axis=0)      # (2, 768)
    return (lp, head)


# ---------------------------------------------------------------------------
# Pure-JAX reference mirroring the PyTorch forward (eval mode, unfolded head).
# ---------------------------------------------------------------------------
def torch_reference(kline, report, p):
    D = KLINE_DIM
    x = kline.astype(jnp.float32)                  # encoder sees (L, N, E)
    scale = 1.0 / (D ** 0.5)
    for l in range(NUM_LAYERS):
        wq = p["in_proj_w"][l, :D].T;      bq = p["in_proj_b"][l, :D]
        wk = p["in_proj_w"][l, D:2 * D].T; bk = p["in_proj_b"][l, D:2 * D]
        wv = p["in_proj_w"][l, 2 * D:].T;  bv = p["in_proj_b"][l, 2 * D:]
        q = x @ wq + bq
        k = x @ wk + bk
        v = x @ wv + bv
        sc = jnp.einsum("lne,mne->nlm", q, k) * scale
        a = jax.nn.softmax(sc, axis=-1)
        ctx = jnp.einsum("nlm,mne->lne", a, v)
        attn = ctx @ p["out_proj_w"][l].T + p["out_proj_b"][l]
        x = _layer_norm(x + attn, p["ln1_g"][l], p["ln1_b"][l])
        h = jax.nn.relu(x @ p["lin1_w"][l].T + p["lin1_b"][l])
        ff = h @ p["lin2_w"][l].T + p["lin2_b"][l]
        x = _layer_norm(x + ff, p["ln2_g"][l], p["ln2_b"][l])
    kline_out = x[:, -1, :]                                         # (B, 5)
    report_out = (report.reshape(report.shape[0], -1) @ p["report_fc_w"].T
                  + p["report_fc_b"])                               # (B, 256)
    combined = jnp.concatenate([kline_out, report_out], axis=1)
    return jax.nn.sigmoid(combined @ p["fc_w"].T + p["fc_b"])


if __name__ == "__main__":
    key = random.PRNGKey(0)
    k_kline, k_report, k_param = random.split(key, 3)

    B, S = 2, 8
    kline = random.normal(k_kline, (B, S, KLINE_DIM), jnp.float32)
    report = random.normal(k_report, (B, 1, REPORT_DIM), jnp.float32)

    torch_params = init_torch_params(k_param)
    kernel_params = prep_kernel_params(torch_params)

    out = multimodal_transformer_forward(kline, report, kernel_params)
    out = jax.block_until_ready(out)

    ref = jax.block_until_ready(torch_reference(kline, report, torch_params))
    # Slightly looser tolerance than before: the folded report path changes the
    # f32 summation order ((A@W+b)@v vs A@(W@v)+b@v).
    if not np.allclose(np.asarray(out), np.asarray(ref), rtol=2e-4, atol=5e-5):
        raise AssertionError(
            f"mismatch:\nkernel={np.asarray(out)}\nref={np.asarray(ref)}")

    print("KERNEL_OK")
</pallas_src>

<mosaic_0001>
module attributes {stable_mosaic.version = 11 : i64} {
  func.func @_mm_transformer_kernel(%arg0: i32, %arg1: memref<2x5xf32, #tpu.memory_space<vmem>>, %arg2: memref<2x768xf32, #tpu.memory_space<vmem>>, %arg3: memref<4x32x256xf32, #tpu.memory_space<vmem>>, %arg4: memref<2x768xf32, #tpu.memory_space<vmem>>, %arg5: memref<1x2xf32, #tpu.memory_space<vmem>>) attributes {dimension_semantics = [#tpu.dimension_semantics<arbitrary>], iteration_bounds = array<i64: 1>, scalar_prefetch = 0 : i64, scratch_operands = 0 : i64, tpu.core_type = #tpu.core_type<tc>, window_params = [{pipeline_mode = #tpu.pipeline_mode<synchronous>, transform_indices = @transform_0, window_bounds = array<i64: 2, 5>}, {pipeline_mode = #tpu.pipeline_mode<synchronous>, transform_indices = @transform_1, window_bounds = array<i64: 2, 768>}, {pipeline_mode = #tpu.pipeline_mode<synchronous>, transform_indices = @transform_2, window_bounds = array<i64: 4, 32, 256>}, {pipeline_mode = #tpu.pipeline_mode<synchronous>, transform_indices = @transform_3, window_bounds = array<i64: 2, 768>}, {pipeline_mode = #tpu.pipeline_mode<synchronous>, transform_indices = @transform_4, window_bounds = array<i64: 1, 2>}]} {
    %c0 = arith.constant 0 : index
    %c0_0 = arith.constant 0 : index
    %0 = vector.load %arg1[%c0, %c0_0] : memref<2x5xf32, #tpu.memory_space<vmem>>, vector<2x5xf32>
    %c0_1 = arith.constant 0 : index
    %c0_2 = arith.constant 0 : index
    %c0_3 = arith.constant 0 : index
    %1 = vector.load %arg3[%c0_1, %c0_2, %c0_3] : memref<4x32x256xf32, #tpu.memory_space<vmem>>, vector<1x32x256xf32>
    %2 = vector.shape_cast %1 : vector<1x32x256xf32> to vector<32x256xf32>
    %3 = vector.extract_strided_slice %2 {offsets = [0, 0], sizes = [5, 15], strides = [1, 1]} : vector<32x256xf32> to vector<5x15xf32>
    %4 = vector.extract_strided_slice %2 {offsets = [5, 0], sizes = [5, 5], strides = [1, 1]} : vector<32x256xf32> to vector<5x5xf32>
    %5 = vector.extract_strided_slice %2 {offsets = [10, 0], sizes = [5, 256], strides = [1, 1]} : vector<32x256xf32> to vector<5x256xf32>
    %6 = vector.extract_strided_slice %2 {offsets = [15, 0], sizes = [5, 256], strides = [1, 1]} : vector<32x256xf32> to vector<5x256xf32>
    %7 = vector.extract_strided_slice %2 {offsets = [20, 0], sizes = [1, 15], strides = [1, 1]} : vector<32x256xf32> to vector<1x15xf32>
    %8 = vector.shape_cast %7 : vector<1x15xf32> to vector<15xf32>
    %9 = vector.extract_strided_slice %2 {offsets = [21, 0], sizes = [1, 5], strides = [1, 1]} : vector<32x256xf32> to vector<1x5xf32>
    %10 = vector.shape_cast %9 : vector<1x5xf32> to vector<5xf32>
    %11 = vector.extract_strided_slice %2 {offsets = [22, 0], sizes = [1, 256], strides = [1, 1]} : vector<32x256xf32> to vector<1x256xf32>
    %12 = vector.shape_cast %11 : vector<1x256xf32> to vector<256xf32>
    %13 = vector.extract_strided_slice %2 {offsets = [23, 0], sizes = [1, 5], strides = [1, 1]} : vector<32x256xf32> to vector<1x5xf32>
    %14 = vector.shape_cast %13 : vector<1x5xf32> to vector<5xf32>
    %15 = vector.extract_strided_slice %2 {offsets = [24, 0], sizes = [1, 5], strides = [1, 1]} : vector<32x256xf32> to vector<1x5xf32>
    %16 = vector.shape_cast %15 : vector<1x5xf32> to vector<5xf32>
    %17 = vector.extract_strided_slice %2 {offsets = [25, 0], sizes = [1, 5], strides = [1, 1]} : vector<32x256xf32> to vector<1x5xf32>
    %18 = vector.shape_cast %17 : vector<1x5xf32> to vector<5xf32>
    %19 = vector.extract_strided_slice %2 {offsets = [26, 0], sizes = [1, 5], strides = [1, 1]} : vector<32x256xf32> to vector<1x5xf32>
    %20 = vector.shape_cast %19 : vector<1x5xf32> to vector<5xf32>
    %21 = vector.extract_strided_slice %2 {offsets = [27, 0], sizes = [1, 5], strides = [1, 1]} : vector<32x256xf32> to vector<1x5xf32>
    %22 = vector.shape_cast %21 : vector<1x5xf32> to vector<5xf32>
    %cst = arith.constant dense<0.000000e+00> : vector<2x15xf32>
    %23 = tpu.matmul %0, %3, %cst {dimension_numbers = #tpu.dot_dimension_numbers<[1], [0], [0], [1], [0, 0, 1, 1], [], []>} : vector<2x5xf32>, vector<5x15xf32>, vector<2x15xf32> -> vector<2x15xf32>
    %24 = vector.shape_cast %8 : vector<15xf32> to vector<1x15xf32>
    %25 = vector.broadcast %24 : vector<1x15xf32> to vector<2x15xf32>
    %26 = arith.addf %23, %25 : vector<2x15xf32>
    %27 = vector.extract_strided_slice %26 {offsets = [0, 0], sizes = [2, 5], strides = [1, 1]} : vector<2x15xf32> to vector<2x5xf32>
    %28 = vector.extract_strided_slice %26 {offsets = [0, 5], sizes = [2, 5], strides = [1, 1]} : vector<2x15xf32> to vector<2x5xf32>
    %29 = vector.extract_strided_slice %26 {offsets = [0, 10], sizes = [2, 5], strides = [1, 1]} : vector<2x15xf32> to vector<2x5xf32>
    %cst_4 = arith.constant dense<0.000000e+00> : vector<2x2xf32>
    %30 = tpu.matmul %27, %28, %cst_4 {dimension_numbers = #tpu.dot_dimension_numbers<[1], [1], [0], [0], [0, 0, 1, 0], [], []>} : vector<2x5xf32>, vector<2x5xf32>, vector<2x2xf32> -> vector<2x2xf32>
    %cst_5 = arith.constant 0.44721359 : f32
    %31 = vector.broadcast %cst_5 : f32 to vector<2x2xf32>
    %32 = arith.mulf %30, %31 : vector<2x2xf32>
    %cst_6 = arith.constant dense<0xFF800000> : vector<2xf32>
    %33 = vector.multi_reduction <maximumf>, %32, %cst_6 [1] : vector<2x2xf32> to vector<2xf32>
    %34 = vector.shape_cast %33 : vector<2xf32> to vector<2x1xf32>
    %35 = vector.broadcast %34 : vector<2x1xf32> to vector<2x2xf32>
    %36 = arith.subf %32, %35 : vector<2x2xf32>
    %37 = math.exp %36 : vector<2x2xf32>
    %cst_7 = arith.constant dense<0.000000e+00> : vector<2xf32>
    %38 = vector.multi_reduction <add>, %37, %cst_7 [1] : vector<2x2xf32> to vector<2xf32>
    %39 = vector.shape_cast %38 : vector<2xf32> to vector<2x1xf32>
    %40 = vector.broadcast %39 : vector<2x1xf32> to vector<2x2xf32>
    %41 = arith.divf %37, %40 : vector<2x2xf32>
    %cst_8 = arith.constant dense<0.000000e+00> : vector<2x5xf32>
    %42 = tpu.matmul %41, %29, %cst_8 {dimension_numbers = #tpu.dot_dimension_numbers<[1], [0], [0], [1], [0, 0, 1, 1], [], []>} : vector<2x2xf32>, vector<2x5xf32>, vector<2x5xf32> -> vector<2x5xf32>
    %cst_9 = arith.constant dense<0.000000e+00> : vector<2x5xf32>
    %43 = tpu.matmul %42, %4, %cst_9 {dimension_numbers = #tpu.dot_dimension_numbers<[1], [0], [0], [1], [0, 0, 1, 1], [], []>} : vector<2x5xf32>, vector<5x5xf32>, vector<2x5xf32> -> vector<2x5xf32>
    %44 = vector.shape_cast %10 : vector<5xf32> to vector<1x5xf32>
    %45 = vector.broadcast %44 : vector<1x5xf32> to vector<2x5xf32>
    %46 = arith.addf %43, %45 : vector<2x5xf32>
    %47 = arith.addf %0, %46 : vector<2x5xf32>
    %cst_10 = arith.constant dense<0.000000e+00> : vector<2xf32>
    %48 = vector.multi_reduction <add>, %47, %cst_10 [1] : vector<2x5xf32> to vector<2xf32>
    %49 = vector.shape_cast %48 : vector<2xf32> to vector<2x1xf32>
    %cst_11 = arith.constant 5.000000e+00 : f32
    %50 = vector.broadcast %cst_11 : f32 to vector<2x1xf32>
    %51 = arith.divf %49, %50 : vector<2x1xf32>
    %52 = vector.broadcast %51 : vector<2x1xf32> to vector<2x5xf32>
    %53 = arith.subf %47, %52 : vector<2x5xf32>
    %54 = arith.mulf %53, %53 : vector<2x5xf32>
    %cst_12 = arith.constant dense<0.000000e+00> : vector<2xf32>
    %55 = vector.multi_reduction <add>, %54, %cst_12 [1] : vector<2x5xf32> to vector<2xf32>
    %56 = vector.shape_cast %55 : vector<2xf32> to vector<2x1xf32>
    %cst_13 = arith.constant 5.000000e+00 : f32
    %57 = vector.broadcast %cst_13 : f32 to vector<2x1xf32>
    %58 = arith.divf %56, %57 : vector<2x1xf32>
    %cst_14 = arith.constant 9.99999974E-6 : f32
    %59 = vector.broadcast %cst_14 : f32 to vector<2x1xf32>
    %60 = arith.addf %58, %59 : vector<2x1xf32>
    %61 = math.rsqrt %60 : vector<2x1xf32>
    %62 = vector.broadcast %61 : vector<2x1xf32> to vector<2x5xf32>
    %63 = arith.mulf %53, %62 : vector<2x5xf32>
    %64 = vector.shape_cast %16 : vector<5xf32> to vector<1x5xf32>
    %65 = vector.broadcast %64 : vector<1x5xf32> to vector<2x5xf32>
    %66 = arith.mulf %63, %65 : vector<2x5xf32>
    %67 = vector.shape_cast %18 : vector<5xf32> to vector<1x5xf32>
    %68 = vector.broadcast %67 : vector<1x5xf32> to vector<2x5xf32>
    %69 = arith.addf %66, %68 : vector<2x5xf32>
    %cst_15 = arith.constant dense<0.000000e+00> : vector<2x256xf32>
    %70 = tpu.matmul %69, %5, %cst_15 {dimension_numbers = #tpu.dot_dimension_numbers<[1], [0], [0], [1], [0, 0, 1, 1], [], []>} : vector<2x5xf32>, vector<5x256xf32>, vector<2x256xf32> -> vector<2x256xf32>
    %71 = vector.shape_cast %12 : vector<256xf32> to vector<1x256xf32>
    %72 = vector.broadcast %71 : vector<1x256xf32> to vector<2x256xf32>
    %73 = arith.addf %70, %72 : vector<2x256xf32>
    %cst_16 = arith.constant 0.000000e+00 : f32
    %74 = vector.broadcast %cst_16 : f32 to vector<2x256xf32>
    %75 = arith.maximumf %73, %74 : vector<2x256xf32>
    %cst_17 = arith.constant dense<0.000000e+00> : vector<2x5xf32>
    %76 = tpu.matmul %75, %6, %cst_17 {dimension_numbers = #tpu.dot_dimension_numbers<[1], [1], [0], [0], [0, 0, 1, 0], [], []>} : vector<2x256xf32>, vector<5x256xf32>, vector<2x5xf32> -> vector<2x5xf32>
    %77 = vector.shape_cast %14 : vector<5xf32> to vector<1x5xf32>
    %78 = vector.broadcast %77 : vector<1x5xf32> to vector<2x5xf32>
    %79 = arith.addf %76, %78 : vector<2x5xf32>
    %80 = arith.addf %69, %79 : vector<2x5xf32>
    %cst_18 = arith.constant dense<0.000000e+00> : vector<2xf32>
    %81 = vector.multi_reduction <add>, %80, %cst_18 [1] : vector<2x5xf32> to vector<2xf32>
    %82 = vector.shape_cast %81 : vector<2xf32> to vector<2x1xf32>
    %cst_19 = arith.constant 5.000000e+00 : f32
    %83 = vector.broadcast %cst_19 : f32 to vector<2x1xf32>
    %84 = arith.divf %82, %83 : vector<2x1xf32>
    %85 = vector.broadcast %84 : vector<2x1xf32> to vector<2x5xf32>
    %86 = arith.subf %80, %85 : vector<2x5xf32>
    %87 = arith.mulf %86, %86 : vector<2x5xf32>
    %cst_20 = arith.constant dense<0.000000e+00> : vector<2xf32>
    %88 = vector.multi_reduction <add>, %87, %cst_20 [1] : vector<2x5xf32> to vector<2xf32>
    %89 = vector.shape_cast %88 : vector<2xf32> to vector<2x1xf32>
    %cst_21 = arith.constant 5.000000e+00 : f32
    %90 = vector.broadcast %cst_21 : f32 to vector<2x1xf32>
    %91 = arith.divf %89, %90 : vector<2x1xf32>
    %cst_22 = arith.constant 9.99999974E-6 : f32
    %92 = vector.broadcast %cst_22 : f32 to vector<2x1xf32>
    %93 = arith.addf %91, %92 : vector<2x1xf32>
    %94 = math.rsqrt %93 : vector<2x1xf32>
    %95 = vector.broadcast %94 : vector<2x1xf32> to vector<2x5xf32>
    %96 = arith.mulf %86, %95 : vector<2x5xf32>
    %97 = vector.shape_cast %20 : vector<5xf32> to vector<1x5xf32>
    %98 = vector.broadcast %97 : vector<1x5xf32> to vector<2x5xf32>
    %99 = arith.mulf %96, %98 : vector<2x5xf32>
    %100 = vector.shape_cast %22 : vector<5xf32> to vector<1x5xf32>
    %101 = vector.broadcast %100 : vector<1x5xf32> to vector<2x5xf32>
    %102 = arith.addf %99, %101 : vector<2x5xf32>
    %c1 = arith.constant 1 : index
    %c0_23 = arith.constant 0 : index
    %c0_24 = arith.constant 0 : index
    %103 = vector.load %arg3[%c1, %c0_23, %c0_24] : memref<4x32x256xf32, #tpu.memory_space<vmem>>, vector<1x32x256xf32>
    %104 = vector.shape_cast %103 : vector<1x32x256xf32> to vector<32x256xf32>
    %105 = vector.extract_strided_slice %104 {offsets = [0, 0], sizes = [5, 15], strides = [1, 1]} : vector<32x256xf32> to vector<5x15xf32>
    %106 = vector.extract_strided_slice %104 {offsets = [5, 0], sizes = [5, 5], strides = [1, 1]} : vector<32x256xf32> to vector<5x5xf32>
    %107 = vector.extract_strided_slice %104 {offsets = [10, 0], sizes = [5, 256], strides = [1, 1]} : vector<32x256xf32> to vector<5x256xf32>
    %108 = vector.extract_strided_slice %104 {offsets = [15, 0], sizes = [5, 256], strides = [1, 1]} : vector<32x256xf32> to vector<5x256xf32>
    %109 = vector.extract_strided_slice %104 {offsets = [20, 0], sizes = [1, 15], strides = [1, 1]} : vector<32x256xf32> to vector<1x15xf32>
    %110 = vector.shape_cast %109 : vector<1x15xf32> to vector<15xf32>
    %111 = vector.extract_strided_slice %104 {offsets = [21, 0], sizes = [1, 5], strides = [1, 1]} : vector<32x256xf32> to vector<1x5xf32>
    %112 = vector.shape_cast %111 : vector<1x5xf32> to vector<5xf32>
    %113 = vector.extract_strided_slice %104 {offsets = [22, 0], sizes = [1, 256], strides = [1, 1]} : vector<32x256xf32> to vector<1x256xf32>
    %114 = vector.shape_cast %113 : vector<1x256xf32> to vector<256xf32>
    %115 = vector.extract_strided_slice %104 {offsets = [23, 0], sizes = [1, 5], strides = [1, 1]} : vector<32x256xf32> to vector<1x5xf32>
    %116 = vector.shape_cast %115 : vector<1x5xf32> to vector<5xf32>
    %117 = vector.extract_strided_slice %104 {offsets = [24, 0], sizes = [1, 5], strides = [1, 1]} : vector<32x256xf32> to vector<1x5xf32>
    %118 = vector.shape_cast %117 : vector<1x5xf32> to vector<5xf32>
    %119 = vector.extract_strided_slice %104 {offsets = [25, 0], sizes = [1, 5], strides = [1, 1]} : vector<32x256xf32> to vector<1x5xf32>
    %120 = vector.shape_cast %119 : vector<1x5xf32> to vector<5xf32>
    %121 = vector.extract_strided_slice %104 {offsets = [26, 0], sizes = [1, 5], strides = [1, 1]} : vector<32x256xf32> to vector<1x5xf32>
    %122 = vector.shape_cast %121 : vector<1x5xf32> to vector<5xf32>
    %123 = vector.extract_strided_slice %104 {offsets = [27, 0], sizes = [1, 5], strides = [1, 1]} : vector<32x256xf32> to vector<1x5xf32>
    %124 = vector.shape_cast %123 : vector<1x5xf32> to vector<5xf32>
    %cst_25 = arith.constant dense<0.000000e+00> : vector<2x15xf32>
    %125 = tpu.matmul %102, %105, %cst_25 {dimension_numbers = #tpu.dot_dimension_numbers<[1], [0], [0], [1], [0, 0, 1, 1], [], []>} : vector<2x5xf32>, vector<5x15xf32>, vector<2x15xf32> -> vector<2x15xf32>
    %126 = vector.shape_cast %110 : vector<15xf32> to vector<1x15xf32>
    %127 = vector.broadcast %126 : vector<1x15xf32> to vector<2x15xf32>
    %128 = arith.addf %125, %127 : vector<2x15xf32>
    %129 = vector.extract_strided_slice %128 {offsets = [0, 0], sizes = [2, 5], strides = [1, 1]} : vector<2x15xf32> to vector<2x5xf32>
    %130 = vector.extract_strided_slice %128 {offsets = [0, 5], sizes = [2, 5], strides = [1, 1]} : vector<2x15xf32> to vector<2x5xf32>
    %131 = vector.extract_strided_slice %128 {offsets = [0, 10], sizes = [2, 5], strides = [1, 1]} : vector<2x15xf32> to vector<2x5xf32>
    %cst_26 = arith.constant dense<0.000000e+00> : vector<2x2xf32>
    %132 = tpu.matmul %129, %130, %cst_26 {dimension_numbers = #tpu.dot_dimension_numbers<[1], [1], [0], [0], [0, 0, 1, 0], [], []>} : vector<2x5xf32>, vector<2x5xf32>, vector<2x2xf32> -> vector<2x2xf32>
    %cst_27 = arith.constant 0.44721359 : f32
    %133 = vector.broadcast %cst_27 : f32 to vector<2x2xf32>
    %134 = arith.mulf %132, %133 : vector<2x2xf32>
    %cst_28 = arith.constant dense<0xFF800000> : vector<2xf32>
    %135 = vector.multi_reduction <maximumf>, %134, %cst_28 [1] : vector<2x2xf32> to vector<2xf32>
    %136 = vector.shape_cast %135 : vector<2xf32> to vector<2x1xf32>
    %137 = vector.broadcast %136 : vector<2x1xf32> to vector<2x2xf32>
    %138 = arith.subf %134, %137 : vector<2x2xf32>
    %139 = math.exp %138 : vector<2x2xf32>
    %cst_29 = arith.constant dense<0.000000e+00> : vector<2xf32>
    %140 = vector.multi_reduction <add>, %139, %cst_29 [1] : vector<2x2xf32> to vector<2xf32>
    %141 = vector.shape_cast %140 : vector<2xf32> to vector<2x1xf32>
    %142 = vector.broadcast %141 : vector<2x1xf32> to vector<2x2xf32>
    %143 = arith.divf %139, %142 : vector<2x2xf32>
    %cst_30 = arith.constant dense<0.000000e+00> : vector<2x5xf32>
    %144 = tpu.matmul %143, %131, %cst_30 {dimension_numbers = #tpu.dot_dimension_numbers<[1], [0], [0], [1], [0, 0, 1, 1], [], []>} : vector<2x2xf32>, vector<2x5xf32>, vector<2x5xf32> -> vector<2x5xf32>
    %cst_31 = arith.constant dense<0.000000e+00> : vector<2x5xf32>
    %145 = tpu.matmul %144, %106, %cst_31 {dimension_numbers = #tpu.dot_dimension_numbers<[1], [0], [0], [1], [0, 0, 1, 1], [], []>} : vector<2x5xf32>, vector<5x5xf32>, vector<2x5xf32> -> vector<2x5xf32>
    %146 = vector.shape_cast %112 : vector<5xf32> to vector<1x5xf32>
    %147 = vector.broadcast %146 : vector<1x5xf32> to vector<2x5xf32>
    %148 = arith.addf %145, %147 : vector<2x5xf32>
    %149 = arith.addf %102, %148 : vector<2x5xf32>
    %cst_32 = arith.constant dense<0.000000e+00> : vector<2xf32>
    %150 = vector.multi_reduction <add>, %149, %cst_32 [1] : vector<2x5xf32> to vector<2xf32>
    %151 = vector.shape_cast %150 : vector<2xf32> to vector<2x1xf32>
    %cst_33 = arith.constant 5.000000e+00 : f32
    %152 = vector.broadcast %cst_33 : f32 to vector<2x1xf32>
    %153 = arith.divf %151, %152 : vector<2x1xf32>
    %154 = vector.broadcast %153 : vector<2x1xf32> to vector<2x5xf32>
    %155 = arith.subf %149, %154 : vector<2x5xf32>
    %156 = arith.mulf %155, %155 : vector<2x5xf32>
    %cst_34 = arith.constant dense<0.000000e+00> : vector<2xf32>
    %157 = vector.multi_reduction <add>, %156, %cst_34 [1] : vector<2x5xf32> to vector<2xf32>
    %158 = vector.shape_cast %157 : vector<2xf32> to vector<2x1xf32>
    %cst_35 = arith.constant 5.000000e+00 : f32
    %159 = vector.broadcast %cst_35 : f32 to vector<2x1xf32>
    %160 = arith.divf %158, %159 : vector<2x1xf32>
    %cst_36 = arith.constant 9.99999974E-6 : f32
    %161 = vector.broadcast %cst_36 : f32 to vector<2x1xf32>
    %162 = arith.addf %160, %161 : vector<2x1xf32>
    %163 = math.rsqrt %162 : vector<2x1xf32>
    %164 = vector.broadcast %163 : vector<2x1xf32> to vector<2x5xf32>
    %165 = arith.mulf %155, %164 : vector<2x5xf32>
    %166 = vector.shape_cast %118 : vector<5xf32> to vector<1x5xf32>
    %167 = vector.broadcast %166 : vector<1x5xf32> to vector<2x5xf32>
    %168 = arith.mulf %165, %167 : vector<2x5xf32>
    %169 = vector.shape_cast %120 : vector<5xf32> to vector<1x5xf32>
    %170 = vector.broadcast %169 : vector<1x5xf32> to vector<2x5xf32>
    %171 = arith.addf %168, %170 : vector<2x5xf32>
    %cst_37 = arith.constant dense<0.000000e+00> : vector<2x256xf32>
    %172 = tpu.matmul %171, %107, %cst_37 {dimension_numbers = #tpu.dot_dimension_numbers<[1], [0], [0], [1], [0, 0, 1, 1], [], []>} : vector<2x5xf32>, vector<5x256xf32>, vector<2x256xf32> -> vector<2x256xf32>
    %173 = vector.shape_cast %114 : vector<256xf32> to vector<1x256xf32>
    %174 = vector.broadcast %173 : vector<1x256xf32> to vector<2x256xf32>
    %175 = arith.addf %172, %174 : vector<2x256xf32>
    %cst_38 = arith.constant 0.000000e+00 : f32
    %176 = vector.broadcast %cst_38 : f32 to vector<2x256xf32>
    %177 = arith.maximumf %175, %176 : vector<2x256xf32>
    %cst_39 = arith.constant dense<0.000000e+00> : vector<2x5xf32>
    %178 = tpu.matmul %177, %108, %cst_39 {dimension_numbers = #tpu.dot_dimension_numbers<[1], [1], [0], [0], [0, 0, 1, 0], [], []>} : vector<2x256xf32>, vector<5x256xf32>, vector<2x5xf32> -> vector<2x5xf32>
    %179 = vector.shape_cast %116 : vector<5xf32> to vector<1x5xf32>
    %180 = vector.broadcast %179 : vector<1x5xf32> to vector<2x5xf32>
    %181 = arith.addf %178, %180 : vector<2x5xf32>
    %182 = arith.addf %171, %181 : vector<2x5xf32>
    %cst_40 = arith.constant dense<0.000000e+00> : vector<2xf32>
    %183 = vector.multi_reduction <add>, %182, %cst_40 [1] : vector<2x5xf32> to vector<2xf32>
    %184 = vector.shape_cast %183 : vector<2xf32> to vector<2x1xf32>
    %cst_41 = arith.constant 5.000000e+00 : f32
    %185 = vector.broadcast %cst_41 : f32 to vector<2x1xf32>
    %186 = arith.divf %184, %185 : vector<2x1xf32>
    %187 = vector.broadcast %186 : vector<2x1xf32> to vector<2x5xf32>
    %188 = arith.subf %182, %187 : vector<2x5xf32>
    %189 = arith.mulf %188, %188 : vector<2x5xf32>
    %cst_42 = arith.constant dense<0.000000e+00> : vector<2xf32>
    %190 = vector.multi_reduction <add>, %189, %cst_42 [1] : vector<2x5xf32> to vector<2xf32>
    %191 = vector.shape_cast %190 : vector<2xf32> to vector<2x1xf32>
    %cst_43 = arith.constant 5.000000e+00 : f32
    %192 = vector.broadcast %cst_43 : f32 to vector<2x1xf32>
    %193 = arith.divf %191, %192 : vector<2x1xf32>
    %cst_44 = arith.constant 9.99999974E-6 : f32
    %194 = vector.broadcast %cst_44 : f32 to vector<2x1xf32>
    %195 = arith.addf %193, %194 : vector<2x1xf32>
    %196 = math.rsqrt %195 : vector<2x1xf32>
    %197 = vector.broadcast %196 : vector<2x1xf32> to vector<2x5xf32>
    %198 = arith.mulf %188, %197 : vector<2x5xf32>
    %199 = vector.shape_cast %122 : vector<5xf32> to vector<1x5xf32>
    %200 = vector.broadcast %199 : vector<1x5xf32> to vector<2x5xf32>
    %201 = arith.mulf %198, %200 : vector<2x5xf32>
    %202 = vector.shape_cast %124 : vector<5xf32> to vector<1x5xf32>
    %203 = vector.broadcast %202 : vector<1x5xf32> to vector<2x5xf32>
    %204 = arith.addf %201, %203 : vector<2x5xf32>
    %c2 = arith.constant 2 : index
    %c0_45 = arith.constant 0 : index
    %c0_46 = arith.constant 0 : index
    %205 = vector.load %arg3[%c2, %c0_45, %c0_46] : memref<4x32x256xf32, #tpu.memory_space<vmem>>, vector<1x32x256xf32>
    %206 = vector.shape_cast %205 : vector<1x32x256xf32> to vector<32x256xf32>
    %207 = vector.extract_strided_slice %206 {offsets = [0, 0], sizes = [5, 15], strides = [1, 1]} : vector<32x256xf32> to vector<5x15xf32>
    %208 = vector.extract_strided_slice %206 {offsets = [5, 0], sizes = [5, 5], strides = [1, 1]} : vector<32x256xf32> to vector<5x5xf32>
    %209 = vector.extract_strided_slice %206 {offsets = [10, 0], sizes = [5, 256], strides = [1, 1]} : vector<32x256xf32> to vector<5x256xf32>
    %210 = vector.extract_strided_slice %206 {offsets = [15, 0], sizes = [5, 256], strides = [1, 1]} : vector<32x256xf32> to vector<5x256xf32>
    %211 = vector.extract_strided_slice %206 {offsets = [20, 0], sizes = [1, 15], strides = [1, 1]} : vector<32x256xf32> to vector<1x15xf32>
    %212 = vector.shape_cast %211 : vector<1x15xf32> to vector<15xf32>
    %213 = vector.extract_strided_slice %206 {offsets = [21, 0], sizes = [1, 5], strides = [1, 1]} : vector<32x256xf32> to vector<1x5xf32>
    %214 = vector.shape_cast %213 : vector<1x5xf32> to vector<5xf32>
    %215 = vector.extract_strided_slice %206 {offsets = [22, 0], sizes = [1, 256], strides = [1, 1]} : vector<32x256xf32> to vector<1x256xf32>
    %216 = vector.shape_cast %215 : vector<1x256xf32> to vector<256xf32>
    %217 = vector.extract_strided_slice %206 {offsets = [23, 0], sizes = [1, 5], strides = [1, 1]} : vector<32x256xf32> to vector<1x5xf32>
    %218 = vector.shape_cast %217 : vector<1x5xf32> to vector<5xf32>
    %219 = vector.extract_strided_slice %206 {offsets = [24, 0], sizes = [1, 5], strides = [1, 1]} : vector<32x256xf32> to vector<1x5xf32>
    %220 = vector.shape_cast %219 : vector<1x5xf32> to vector<5xf32>
    %221 = vector.extract_strided_slice %206 {offsets = [25, 0], sizes = [1, 5], strides = [1, 1]} : vector<32x256xf32> to vector<1x5xf32>
    %222 = vector.shape_cast %221 : vector<1x5xf32> to vector<5xf32>
    %223 = vector.extract_strided_slice %206 {offsets = [26, 0], sizes = [1, 5], strides = [1, 1]} : vector<32x256xf32> to vector<1x5xf32>
    %224 = vector.shape_cast %223 : vector<1x5xf32> to vector<5xf32>
    %225 = vector.extract_strided_slice %206 {offsets = [27, 0], sizes = [1, 5], strides = [1, 1]} : vector<32x256xf32> to vector<1x5xf32>
    %226 = vector.shape_cast %225 : vector<1x5xf32> to vector<5xf32>
    %cst_47 = arith.constant dense<0.000000e+00> : vector<2x15xf32>
    %227 = tpu.matmul %204, %207, %cst_47 {dimension_numbers = #tpu.dot_dimension_numbers<[1], [0], [0], [1], [0, 0, 1, 1], [], []>} : vector<2x5xf32>, vector<5x15xf32>, vector<2x15xf32> -> vector<2x15xf32>
    %228 = vector.shape_cast %212 : vector<15xf32> to vector<1x15xf32>
    %229 = vector.broadcast %228 : vector<1x15xf32> to vector<2x15xf32>
    %230 = arith.addf %227, %229 : vector<2x15xf32>
    %231 = vector.extract_strided_slice %230 {offsets = [0, 0], sizes = [2, 5], strides = [1, 1]} : vector<2x15xf32> to vector<2x5xf32>
    %232 = vector.extract_strided_slice %230 {offsets = [0, 5], sizes = [2, 5], strides = [1, 1]} : vector<2x15xf32> to vector<2x5xf32>
    %233 = vector.extract_strided_slice %230 {offsets = [0, 10], sizes = [2, 5], strides = [1, 1]} : vector<2x15xf32> to vector<2x5xf32>
    %cst_48 = arith.constant dense<0.000000e+00> : vector<2x2xf32>
    %234 = tpu.matmul %231, %232, %cst_48 {dimension_numbers = #tpu.dot_dimension_numbers<[1], [1], [0], [0], [0, 0, 1, 0], [], []>} : vector<2x5xf32>, vector<2x5xf32>, vector<2x2xf32> -> vector<2x2xf32>
    %cst_49 = arith.constant 0.44721359 : f32
    %235 = vector.broadcast %cst_49 : f32 to vector<2x2xf32>
    %236 = arith.mulf %234, %235 : vector<2x2xf32>
    %cst_50 = arith.constant dense<0xFF800000> : vector<2xf32>
    %237 = vector.multi_reduction <maximumf>, %236, %cst_50 [1] : vector<2x2xf32> to vector<2xf32>
    %238 = vector.shape_cast %237 : vector<2xf32> to vector<2x1xf32>
    %239 = vector.broadcast %238 : vector<2x1xf32> to vector<2x2xf32>
    %240 = arith.subf %236, %239 : vector<2x2xf32>
    %241 = math.exp %240 : vector<2x2xf32>
    %cst_51 = arith.constant dense<0.000000e+00> : vector<2xf32>
    %242 = vector.multi_reduction <add>, %241, %cst_51 [1] : vector<2x2xf32> to vector<2xf32>
    %243 = vector.shape_cast %242 : vector<2xf32> to vector<2x1xf32>
    %244 = vector.broadcast %243 : vector<2x1xf32> to vector<2x2xf32>
    %245 = arith.divf %241, %244 : vector<2x2xf32>
    %cst_52 = arith.constant dense<0.000000e+00> : vector<2x5xf32>
    %246 = tpu.matmul %245, %233, %cst_52 {dimension_numbers = #tpu.dot_dimension_numbers<[1], [0], [0], [1], [0, 0, 1, 1], [], []>} : vector<2x2xf32>, vector<2x5xf32>, vector<2x5xf32> -> vector<2x5xf32>
    %cst_53 = arith.constant dense<0.000000e+00> : vector<2x5xf32>
    %247 = tpu.matmul %246, %208, %cst_53 {dimension_numbers = #tpu.dot_dimension_numbers<[1], [0], [0], [1], [0, 0, 1, 1], [], []>} : vector<2x5xf32>, vector<5x5xf32>, vector<2x5xf32> -> vector<2x5xf32>
    %248 = vector.shape_cast %214 : vector<5xf32> to vector<1x5xf32>
    %249 = vector.broadcast %248 : vector<1x5xf32> to vector<2x5xf32>
    %250 = arith.addf %247, %249 : vector<2x5xf32>
    %251 = arith.addf %204, %250 : vector<2x5xf32>
    %cst_54 = arith.constant dense<0.000000e+00> : vector<2xf32>
    %252 = vector.multi_reduction <add>, %251, %cst_54 [1] : vector<2x5xf32> to vector<2xf32>
    %253 = vector.shape_cast %252 : vector<2xf32> to vector<2x1xf32>
    %cst_55 = arith.constant 5.000000e+00 : f32
    %254 = vector.broadcast %cst_55 : f32 to vector<2x1xf32>
    %255 = arith.divf %253, %254 : vector<2x1xf32>
    %256 = vector.broadcast %255 : vector<2x1xf32> to vector<2x5xf32>
    %257 = arith.subf %251, %256 : vector<2x5xf32>
    %258 = arith.mulf %257, %257 : vector<2x5xf32>
    %cst_56 = arith.constant dense<0.000000e+00> : vector<2xf32>
    %259 = vector.multi_reduction <add>, %258, %cst_56 [1] : vector<2x5xf32> to vector<2xf32>
    %260 = vector.shape_cast %259 : vector<2xf32> to vector<2x1xf32>
    %cst_57 = arith.constant 5.000000e+00 : f32
    %261 = vector.broadcast %cst_57 : f32 to vector<2x1xf32>
    %262 = arith.divf %260, %261 : vector<2x1xf32>
    %cst_58 = arith.constant 9.99999974E-6 : f32
    %263 = vector.broadcast %cst_58 : f32 to vector<2x1xf32>
    %264 = arith.addf %262, %263 : vector<2x1xf32>
    %265 = math.rsqrt %264 : vector<2x1xf32>
    %266 = vector.broadcast %265 : vector<2x1xf32> to vector<2x5xf32>
    %267 = arith.mulf %257, %266 : vector<2x5xf32>
    %268 = vector.shape_cast %220 : vector<5xf32> to vector<1x5xf32>
    %269 = vector.broadcast %268 : vector<1x5xf32> to vector<2x5xf32>
    %270 = arith.mulf %267, %269 : vector<2x5xf32>
    %271 = vector.shape_cast %222 : vector<5xf32> to vector<1x5xf32>
    %272 = vector.broadcast %271 : vector<1x5xf32> to vector<2x5xf32>
    %273 = arith.addf %270, %272 : vector<2x5xf32>
    %cst_59 = arith.constant dense<0.000000e+00> : vector<2x256xf32>
    %274 = tpu.matmul %273, %209, %cst_59 {dimension_numbers = #tpu.dot_dimension_numbers<[1], [0], [0], [1], [0, 0, 1, 1], [], []>} : vector<2x5xf32>, vector<5x256xf32>, vector<2x256xf32> -> vector<2x256xf32>
    %275 = vector.shape_cast %216 : vector<256xf32> to vector<1x256xf32>
    %276 = vector.broadcast %275 : vector<1x256xf32> to vector<2x256xf32>
    %277 = arith.addf %274, %276 : vector<2x256xf32>
    %cst_60 = arith.constant 0.000000e+00 : f32
    %278 = vector.broadcast %cst_60 : f32 to vector<2x256xf32>
    %279 = arith.maximumf %277, %278 : vector<2x256xf32>
    %cst_61 = arith.constant dense<0.000000e+00> : vector<2x5xf32>
    %280 = tpu.matmul %279, %210, %cst_61 {dimension_numbers = #tpu.dot_dimension_numbers<[1], [1], [0], [0], [0, 0, 1, 0], [], []>} : vector<2x256xf32>, vector<5x256xf32>, vector<2x5xf32> -> vector<2x5xf32>
    %281 = vector.shape_cast %218 : vector<5xf32> to vector<1x5xf32>
    %282 = vector.broadcast %281 : vector<1x5xf32> to vector<2x5xf32>
    %283 = arith.addf %280, %282 : vector<2x5xf32>
    %284 = arith.addf %273, %283 : vector<2x5xf32>
    %cst_62 = arith.constant dense<0.000000e+00> : vector<2xf32>
    %285 = vector.multi_reduction <add>, %284, %cst_62 [1] : vector<2x5xf32> to vector<2xf32>
    %286 = vector.shape_cast %285 : vector<2xf32> to vector<2x1xf32>
    %cst_63 = arith.constant 5.000000e+00 : f32
    %287 = vector.broadcast %cst_63 : f32 to vector<2x1xf32>
    %288 = arith.divf %286, %287 : vector<2x1xf32>
    %289 = vector.broadcast %288 : vector<2x1xf32> to vector<2x5xf32>
    %290 = arith.subf %284, %289 : vector<2x5xf32>
    %291 = arith.mulf %290, %290 : vector<2x5xf32>
    %cst_64 = arith.constant dense<0.000000e+00> : vector<2xf32>
    %292 = vector.multi_reduction <add>, %291, %cst_64 [1] : vector<2x5xf32> to vector<2xf32>
    %293 = vector.shape_cast %292 : vector<2xf32> to vector<2x1xf32>
    %cst_65 = arith.constant 5.000000e+00 : f32
    %294 = vector.broadcast %cst_65 : f32 to vector<2x1xf32>
    %295 = arith.divf %293, %294 : vector<2x1xf32>
    %cst_66 = arith.constant 9.99999974E-6 : f32
    %296 = vector.broadcast %cst_66 : f32 to vector<2x1xf32>
    %297 = arith.addf %295, %296 : vector<2x1xf32>
    %298 = math.rsqrt %297 : vector<2x1xf32>
    %299 = vector.broadcast %298 : vector<2x1xf32> to vector<2x5xf32>
    %300 = arith.mulf %290, %299 : vector<2x5xf32>
    %301 = vector.shape_cast %224 : vector<5xf32> to vector<1x5xf32>
    %302 = vector.broadcast %301 : vector<1x5xf32> to vector<2x5xf32>
    %303 = arith.mulf %300, %302 : vector<2x5xf32>
    %304 = vector.shape_cast %226 : vector<5xf32> to vector<1x5xf32>
    %305 = vector.broadcast %304 : vector<1x5xf32> to vector<2x5xf32>
    %306 = arith.addf %303, %305 : vector<2x5xf32>
    %c3 = arith.constant 3 : index
    %c0_67 = arith.constant 0 : index
    %c0_68 = arith.constant 0 : index
    %307 = vector.load %arg3[%c3, %c0_67, %c0_68] : memref<4x32x256xf32, #tpu.memory_space<vmem>>, vector<1x32x256xf32>
    %308 = vector.shape_cast %307 : vector<1x32x256xf32> to vector<32x256xf32>
    %309 = vector.extract_strided_slice %308 {offsets = [0, 0], sizes = [5, 15], strides = [1, 1]} : vector<32x256xf32> to vector<5x15xf32>
    %310 = vector.extract_strided_slice %308 {offsets = [5, 0], sizes = [5, 5], strides = [1, 1]} : vector<32x256xf32> to vector<5x5xf32>
    %311 = vector.extract_strided_slice %308 {offsets = [10, 0], sizes = [5, 256], strides = [1, 1]} : vector<32x256xf32> to vector<5x256xf32>
    %312 = vector.extract_strided_slice %308 {offsets = [15, 0], sizes = [5, 256], strides = [1, 1]} : vector<32x256xf32> to vector<5x256xf32>
    %313 = vector.extract_strided_slice %308 {offsets = [20, 0], sizes = [1, 15], strides = [1, 1]} : vector<32x256xf32> to vector<1x15xf32>
    %314 = vector.shape_cast %313 : vector<1x15xf32> to vector<15xf32>
    %315 = vector.extract_strided_slice %308 {offsets = [21, 0], sizes = [1, 5], strides = [1, 1]} : vector<32x256xf32> to vector<1x5xf32>
    %316 = vector.shape_cast %315 : vector<1x5xf32> to vector<5xf32>
    %317 = vector.extract_strided_slice %308 {offsets = [22, 0], sizes = [1, 256], strides = [1, 1]} : vector<32x256xf32> to vector<1x256xf32>
    %318 = vector.shape_cast %317 : vector<1x256xf32> to vector<256xf32>
    %319 = vector.extract_strided_slice %308 {offsets = [23, 0], sizes = [1, 5], strides = [1, 1]} : vector<32x256xf32> to vector<1x5xf32>
    %320 = vector.shape_cast %319 : vector<1x5xf32> to vector<5xf32>
    %321 = vector.extract_strided_slice %308 {offsets = [24, 0], sizes = [1, 5], strides = [1, 1]} : vector<32x256xf32> to vector<1x5xf32>
    %322 = vector.shape_cast %321 : vector<1x5xf32> to vector<5xf32>
    %323 = vector.extract_strided_slice %308 {offsets = [25, 0], sizes = [1, 5], strides = [1, 1]} : vector<32x256xf32> to vector<1x5xf32>
    %324 = vector.shape_cast %323 : vector<1x5xf32> to vector<5xf32>
    %325 = vector.extract_strided_slice %308 {offsets = [26, 0], sizes = [1, 5], strides = [1, 1]} : vector<32x256xf32> to vector<1x5xf32>
    %326 = vector.shape_cast %325 : vector<1x5xf32> to vector<5xf32>
    %327 = vector.extract_strided_slice %308 {offsets = [27, 0], sizes = [1, 5], strides = [1, 1]} : vector<32x256xf32> to vector<1x5xf32>
    %328 = vector.shape_cast %327 : vector<1x5xf32> to vector<5xf32>
    %cst_69 = arith.constant dense<0.000000e+00> : vector<2x15xf32>
    %329 = tpu.matmul %306, %309, %cst_69 {dimension_numbers = #tpu.dot_dimension_numbers<[1], [0], [0], [1], [0, 0, 1, 1], [], []>} : vector<2x5xf32>, vector<5x15xf32>, vector<2x15xf32> -> vector<2x15xf32>
    %330 = vector.shape_cast %314 : vector<15xf32> to vector<1x15xf32>
    %331 = vector.broadcast %330 : vector<1x15xf32> to vector<2x15xf32>
    %332 = arith.addf %329, %331 : vector<2x15xf32>
    %333 = vector.extract_strided_slice %332 {offsets = [0, 0], sizes = [2, 5], strides = [1, 1]} : vector<2x15xf32> to vector<2x5xf32>
    %334 = vector.extract_strided_slice %332 {offsets = [0, 5], sizes = [2, 5], strides = [1, 1]} : vector<2x15xf32> to vector<2x5xf32>
    %335 = vector.extract_strided_slice %332 {offsets = [0, 10], sizes = [2, 5], strides = [1, 1]} : vector<2x15xf32> to vector<2x5xf32>
    %cst_70 = arith.constant dense<0.000000e+00> : vector<2x2xf32>
    %336 = tpu.matmul %333, %334, %cst_70 {dimension_numbers = #tpu.dot_dimension_numbers<[1], [1], [0], [0], [0, 0, 1, 0], [], []>} : vector<2x5xf32>, vector<2x5xf32>, vector<2x2xf32> -> vector<2x2xf32>
    %cst_71 = arith.constant 0.44721359 : f32
    %337 = vector.broadcast %cst_71 : f32 to vector<2x2xf32>
    %338 = arith.mulf %336, %337 : vector<2x2xf32>
    %cst_72 = arith.constant dense<0xFF800000> : vector<2xf32>
    %339 = vector.multi_reduction <maximumf>, %338, %cst_72 [1] : vector<2x2xf32> to vector<2xf32>
    %340 = vector.shape_cast %339 : vector<2xf32> to vector<2x1xf32>
    %341 = vector.broadcast %340 : vector<2x1xf32> to vector<2x2xf32>
    %342 = arith.subf %338, %341 : vector<2x2xf32>
    %343 = math.exp %342 : vector<2x2xf32>
    %cst_73 = arith.constant dense<0.000000e+00> : vector<2xf32>
    %344 = vector.multi_reduction <add>, %343, %cst_73 [1] : vector<2x2xf32> to vector<2xf32>
    %345 = vector.shape_cast %344 : vector<2xf32> to vector<2x1xf32>
    %346 = vector.broadcast %345 : vector<2x1xf32> to vector<2x2xf32>
    %347 = arith.divf %343, %346 : vector<2x2xf32>
    %cst_74 = arith.constant dense<0.000000e+00> : vector<2x5xf32>
    %348 = tpu.matmul %347, %335, %cst_74 {dimension_numbers = #tpu.dot_dimension_numbers<[1], [0], [0], [1], [0, 0, 1, 1], [], []>} : vector<2x2xf32>, vector<2x5xf32>, vector<2x5xf32> -> vector<2x5xf32>
    %cst_75 = arith.constant dense<0.000000e+00> : vector<2x5xf32>
    %349 = tpu.matmul %348, %310, %cst_75 {dimension_numbers = #tpu.dot_dimension_numbers<[1], [0], [0], [1], [0, 0, 1, 1], [], []>} : vector<2x5xf32>, vector<5x5xf32>, vector<2x5xf32> -> vector<2x5xf32>
    %350 = vector.shape_cast %316 : vector<5xf32> to vector<1x5xf32>
    %351 = vector.broadcast %350 : vector<1x5xf32> to vector<2x5xf32>
    %352 = arith.addf %349, %351 : vector<2x5xf32>
    %353 = arith.addf %306, %352 : vector<2x5xf32>
    %cst_76 = arith.constant dense<0.000000e+00> : vector<2xf32>
    %354 = vector.multi_reduction <add>, %353, %cst_76 [1] : vector<2x5xf32> to vector<2xf32>
    %355 = vector.shape_cast %354 : vector<2xf32> to vector<2x1xf32>
    %cst_77 = arith.constant 5.000000e+00 : f32
    %356 = vector.broadcast %cst_77 : f32 to vector<2x1xf32>
    %357 = arith.divf %355, %356 : vector<2x1xf32>
    %358 = vector.broadcast %357 : vector<2x1xf32> to vector<2x5xf32>
    %359 = arith.subf %353, %358 : vector<2x5xf32>
    %360 = arith.mulf %359, %359 : vector<2x5xf32>
    %cst_78 = arith.constant dense<0.000000e+00> : vector<2xf32>
    %361 = vector.multi_reduction <add>, %360, %cst_78 [1] : vector<2x5xf32> to vector<2xf32>
    %362 = vector.shape_cast %361 : vector<2xf32> to vector<2x1xf32>
    %cst_79 = arith.constant 5.000000e+00 : f32
    %363 = vector.broadcast %cst_79 : f32 to vector<2x1xf32>
    %364 = arith.divf %362, %363 : vector<2x1xf32>
    %cst_80 = arith.constant 9.99999974E-6 : f32
    %365 = vector.broadcast %cst_80 : f32 to vector<2x1xf32>
    %366 = arith.addf %364, %365 : vector<2x1xf32>
    %367 = math.rsqrt %366 : vector<2x1xf32>
    %368 = vector.broadcast %367 : vector<2x1xf32> to vector<2x5xf32>
    %369 = arith.mulf %359, %368 : vector<2x5xf32>
    %370 = vector.shape_cast %322 : vector<5xf32> to vector<1x5xf32>
    %371 = vector.broadcast %370 : vector<1x5xf32> to vector<2x5xf32>
    %372 = arith.mulf %369, %371 : vector<2x5xf32>
    %373 = vector.shape_cast %324 : vector<5xf32> to vector<1x5xf32>
    %374 = vector.broadcast %373 : vector<1x5xf32> to vector<2x5xf32>
    %375 = arith.addf %372, %374 : vector<2x5xf32>
    %cst_81 = arith.constant dense<0.000000e+00> : vector<2x256xf32>
    %376 = tpu.matmul %375, %311, %cst_81 {dimension_numbers = #tpu.dot_dimension_numbers<[1], [0], [0], [1], [0, 0, 1, 1], [], []>} : vector<2x5xf32>, vector<5x256xf32>, vector<2x256xf32> -> vector<2x256xf32>
    %377 = vector.shape_cast %318 : vector<256xf32> to vector<1x256xf32>
    %378 = vector.broadcast %377 : vector<1x256xf32> to vector<2x256xf32>
    %379 = arith.addf %376, %378 : vector<2x256xf32>
    %cst_82 = arith.constant 0.000000e+00 : f32
    %380 = vector.broadcast %cst_82 : f32 to vector<2x256xf32>
    %381 = arith.maximumf %379, %380 : vector<2x256xf32>
    %cst_83 = arith.constant dense<0.000000e+00> : vector<2x5xf32>
    %382 = tpu.matmul %381, %312, %cst_83 {dimension_numbers = #tpu.dot_dimension_numbers<[1], [1], [0], [0], [0, 0, 1, 0], [], []>} : vector<2x256xf32>, vector<5x256xf32>, vector<2x5xf32> -> vector<2x5xf32>
    %383 = vector.shape_cast %320 : vector<5xf32> to vector<1x5xf32>
    %384 = vector.broadcast %383 : vector<1x5xf32> to vector<2x5xf32>
    %385 = arith.addf %382, %384 : vector<2x5xf32>
    %386 = arith.addf %375, %385 : vector<2x5xf32>
    %cst_84 = arith.constant dense<0.000000e+00> : vector<2xf32>
    %387 = vector.multi_reduction <add>, %386, %cst_84 [1] : vector<2x5xf32> to vector<2xf32>
    %388 = vector.shape_cast %387 : vector<2xf32> to vector<2x1xf32>
    %cst_85 = arith.constant 5.000000e+00 : f32
    %389 = vector.broadcast %cst_85 : f32 to vector<2x1xf32>
    %390 = arith.divf %388, %389 : vector<2x1xf32>
    %391 = vector.broadcast %390 : vector<2x1xf32> to vector<2x5xf32>
    %392 = arith.subf %386, %391 : vector<2x5xf32>
    %393 = arith.mulf %392, %392 : vector<2x5xf32>
    %cst_86 = arith.constant dense<0.000000e+00> : vector<2xf32>
    %394 = vector.multi_reduction <add>, %393, %cst_86 [1] : vector<2x5xf32> to vector<2xf32>
    %395 = vector.shape_cast %394 : vector<2xf32> to vector<2x1xf32>
    %cst_87 = arith.constant 5.000000e+00 : f32
    %396 = vector.broadcast %cst_87 : f32 to vector<2x1xf32>
    %397 = arith.divf %395, %396 : vector<2x1xf32>
    %cst_88 = arith.constant 9.99999974E-6 : f32
    %398 = vector.broadcast %cst_88 : f32 to vector<2x1xf32>
    %399 = arith.addf %397, %398 : vector<2x1xf32>
    %400 = math.rsqrt %399 : vector<2x1xf32>
    %401 = vector.broadcast %400 : vector<2x1xf32> to vector<2x5xf32>
    %402 = arith.mulf %392, %401 : vector<2x5xf32>
    %403 = vector.shape_cast %326 : vector<5xf32> to vector<1x5xf32>
    %404 = vector.broadcast %403 : vector<1x5xf32> to vector<2x5xf32>
    %405 = arith.mulf %402, %404 : vector<2x5xf32>
    %406 = vector.shape_cast %328 : vector<5xf32> to vector<1x5xf32>
    %407 = vector.broadcast %406 : vector<1x5xf32> to vector<2x5xf32>
    %408 = arith.addf %405, %407 : vector<2x5xf32>
    %c0_89 = arith.constant 0 : index
    %c0_90 = arith.constant 0 : index
    %409 = vector.load %arg4[%c0_89, %c0_90] : memref<2x768xf32, #tpu.memory_space<vmem>>, vector<2x768xf32>
    %410 = vector.extract_strided_slice %409 {offsets = [0, 0], sizes = [1, 768], strides = [1, 1]} : vector<2x768xf32> to vector<1x768xf32>
    %411 = vector.extract_strided_slice %409 {offsets = [1, 0], sizes = [1, 5], strides = [1, 1]} : vector<2x768xf32> to vector<1x5xf32>
    %412 = vector.extract_strided_slice %409 {offsets = [1, 5], sizes = [1, 1], strides = [1, 1]} : vector<2x768xf32> to vector<1x1xf32>
    %cst_91 = arith.constant dense<0.000000e+00> : vector<1x2xf32>
    %413 = tpu.matmul %411, %408, %cst_91 {dimension_numbers = #tpu.dot_dimension_numbers<[1], [1], [0], [0], [0, 0, 1, 0], [], []>} : vector<1x5xf32>, vector<2x5xf32>, vector<1x2xf32> -> vector<1x2xf32>
    %c0_92 = arith.constant 0 : index
    %c0_93 = arith.constant 0 : index
    %414 = vector.load %arg2[%c0_92, %c0_93] : memref<2x768xf32, #tpu.memory_space<vmem>>, vector<2x768xf32>
    %cst_94 = arith.constant dense<0.000000e+00> : vector<1x2xf32>
    %415 = tpu.matmul %410, %414, %cst_94 {dimension_numbers = #tpu.dot_dimension_numbers<[1], [1], [0], [0], [0, 0, 1, 0], [], []>} : vector<1x768xf32>, vector<2x768xf32>, vector<1x2xf32> -> vector<1x2xf32>
    %416 = arith.addf %413, %415 : vector<1x2xf32>
    %417 = vector.broadcast %412 : vector<1x1xf32> to vector<1x2xf32>
    %418 = arith.addf %416, %417 : vector<1x2xf32>
    %419 = arith.negf %418 : vector<1x2xf32>
    %420 = math.exp %419 : vector<1x2xf32>
    %cst_95 = arith.constant 1.000000e+00 : f32
    %421 = vector.broadcast %cst_95 : f32 to vector<1x2xf32>
    %422 = arith.addf %421, %420 : vector<1x2xf32>
    %423 = arith.divf %421, %422 : vector<1x2xf32>
    %c0_96 = arith.constant 0 : index
    %c0_97 = arith.constant 0 : index
    %424 = vector.load %arg5[%c0_96, %c0_97] : memref<1x2xf32, #tpu.memory_space<vmem>>, vector<1x2xf32>
    tpu.vector_store %arg5[%c0_96, %c0_97], %423 {strides = array<i32>} : memref<1x2xf32, #tpu.memory_space<vmem>>, vector<1x2xf32>,
    return
  }
  func.func @transform_0(%arg0: i32) -> (i32, i32) {
    %c0_i32 = arith.constant 0 : i32
    %c0_i32_0 = arith.constant 0 : i32
    %c0_i32_1 = arith.constant 0 : i32
    return %c0_i32, %c0_i32_0 : i32, i32
  }
  func.func @transform_1(%arg0: i32) -> (i32, i32) {
    %c0_i32 = arith.constant 0 : i32
    %c0_i32_0 = arith.constant 0 : i32
    %c0_i32_1 = arith.constant 0 : i32
    return %c0_i32, %c0_i32_0 : i32, i32
  }
  func.func @transform_2(%arg0: i32) -> (i32, i32, i32) {
    %c0_i32 = arith.constant 0 : i32
    %c0_i32_0 = arith.constant 0 : i32
    %c0_i32_1 = arith.constant 0 : i32
    %c0_i32_2 = arith.constant 0 : i32
    return %c0_i32, %c0_i32_0, %c0_i32_1 : i32, i32, i32
  }
  func.func @transform_3(%arg0: i32) -> (i32, i32) {
    %c0_i32 = arith.constant 0 : i32
    %c0_i32_0 = arith.constant 0 : i32
    %c0_i32_1 = arith.constant 0 : i32
    return %c0_i32, %c0_i32_0 : i32, i32
  }
  func.func @transform_4(%arg0: i32) -> (i32, i32) {
    %c0_i32 = arith.constant 0 : i32
    %c0_i32_0 = arith.constant 0 : i32
    %c0_i32_1 = arith.constant 0 : i32
    return %c0_i32, %c0_i32_0 : i32, i32
  }
}

</mosaic_0001>

<bundles_post_ra>
// kernel: tpu_custom_call.1
= control target key start
LH: loop header
LB: loop body
LE: loop exit
PB: predicated region body
PF: predicated region fallthrough
CT: control target
= control target key end

     0   :  { %9 = vsyncpa [#allocation3], 0  ;;  %s3405_s0 = inlined_call_operand.hbm [shape: f32[2,5], index: 0, kind: input, shape index: {}]   ;;  %s3406_s1 = inlined_call_operand.hbm [shape: f32[2,768], index: 1, kind: input, shape index: {}]   ;;  %s3407_s2 = inlined_call_operand.hbm [shape: f32[4,32,256], index: 2, kind: input, shape index: {}]   ;;  %s3408_s3 = inlined_call_operand.hbm [shape: f32[2,768], index: 3, kind: input, shape index: {}]   ;;  %s3409_s4 = inlined_call_operand.hbm [shape: f32[1,2], index: 4, kind: output, shape index: {}]  }
   0x1   :  { %10 = vsyncpa [#allocation6], 0 }
   0x2   :  { %11 = vsyncpa [#allocation9], 0 }
   0x3   :  { %12 = vsyncpa [#allocation4], 0  ;;  %s3050_s15 = smov [#allocation5]   ;;  %s3051_s17 = smov [#allocation2]  }
   0x4   :  { %s29_s16 = sshll.u32 %s3050_s15, 4  ;;  %s19_s18 = sshll.u32 %s3051_s17, 4  ;;  %s30_s16 = int_to_ptr.vmem [resolvable:$true] %s29_s16  ;;  %s20_s18 = int_to_ptr.vmem [resolvable:$true] %s19_s18 }
   0x5   :  { %s2932_s21 = scalar_lea.hbm %s3406_s1, 192 }
   0x6   :  { %p2933_p0 = scmp.ne.s32.totalorder %s3406_s1, %s2932_s21  ;;  %p2936_p1 = scmp.lt.u32.totalorder %s2932_s21, %s3406_s1 }
   0x8   :  { %p2938_p2 = pnand %p2936_p1, %p2933_p0 }
   0xa   :  { %2941 = shalt.err (!%p2938_p2)
}
   0xb   :  { %s2942_s26 = scalar_lea.vmem %s30_s16, 192  ;;  %p2947_p4 = scmp.lt.s32.totalorder %s30_s16, %s30_s16 }
   0xc   :  { %p2943_p3 = scmp.ne.s32.totalorder %s30_s16, %s2942_s26  ;;  %p2948_p5 = scmp.lt.s32.totalorder %s2942_s26, %s2942_s26 }
   0xe   :  { %p2949_p6 = por %p2948_p5, %p2947_p4 }
  0x10   :  { %p2950_p7 = pnand %p2949_p6, %p2943_p3 }
  0x12   :  { %2953 = shalt.err (!%p2950_p7)
}
  0x13   :  { %32 = dma.hbm_to_vmem [thread:$0]  %s3406_s1, 192, %s30_s16, [#allocation6]  }
  0x14   :  { %s2954_s5 = scalar_lea.hbm %s3405_s0, 32 }
  0x15   :  { %p2955_p8 = scmp.ne.s32.totalorder %s3405_s0, %s2954_s5  ;;  %p2958_p9 = scmp.lt.u32.totalorder %s2954_s5, %s3405_s0 }
  0x17   :  { %p2960_p10 = pnand %p2958_p9, %p2955_p8 }
  0x19   :  { %2963 = shalt.err (!%p2960_p10)
}
  0x1a   :  { %s2964_s10 = scalar_lea.vmem %s20_s18, 32  ;;  %p2969_p12 = scmp.lt.s32.totalorder %s20_s18, %s20_s18 }
  0x1b   :  { %p2965_p11 = scmp.ne.s32.totalorder %s20_s18, %s2964_s10  ;;  %p2970_p13 = scmp.lt.s32.totalorder %s2964_s10, %s2964_s10 }
  0x1d   :  { %p2971_p0 = por %p2970_p13, %p2969_p12 }
  0x1f   :  { %p2972_p1 = pnand %p2971_p0, %p2965_p11 }
  0x21   :  { %2975 = shalt.err (!%p2972_p1)
}
  0x22   :  { %22 = dma.hbm_to_vmem [thread:$0]  %s3405_s0, 32, %s20_s18, [#allocation3]  }
  0x23   :  { %s3052_s12 = smov [#allocation7]   ;;  %s2976_s16 = scalar_lea.hbm %s3407_s2, 4096 }
  0x24   :  { %s38_s13 = sshll.u32 %s3052_s12, 4  ;;  %p2977_p2 = scmp.ne.s32.totalorder %s3407_s2, %s2976_s16  ;;  %s39_s13 = int_to_ptr.vmem [resolvable:$true] %s38_s13 }
  0x25   :  { %p2980_p3 = scmp.lt.u32.totalorder %s2976_s16, %s3407_s2 }
  0x27   :  { %p2982_p4 = pnand %p2980_p3, %p2977_p2 }
  0x29   :  { %2985 = shalt.err (!%p2982_p4)
}
  0x2a   :  { %s2986_s22 = scalar_lea.vmem %s39_s13, 4096  ;;  %p2991_p6 = scmp.lt.s32.totalorder %s39_s13, %s39_s13 }
  0x2b   :  { %p2987_p5 = scmp.ne.s32.totalorder %s39_s13, %s2986_s22  ;;  %p2992_p7 = scmp.lt.s32.totalorder %s2986_s22, %s2986_s22 }
  0x2d   :  { %p2993_p8 = por %p2992_p7, %p2991_p6 }
  0x2f   :  { %p2994_p9 = pnand %p2993_p8, %p2987_p5 }
  0x31   :  { %2997 = shalt.err (!%p2994_p9)
}
  0x32   :  { %s3053_s0 = smov 256   ;;  %s3054_s18 = smov 16  }
  0x33   :  { %44 = dma.hbm_to_vmem [thread:$0]  %s3407_s2, 4096, %s39_s13, [#allocation6], %s3053_s0, %s3053_s0, %s3054_s18  }
  0x34   :  { %s3055_s25 = smov [#allocation8]   ;;  %s2998_s29 = scalar_lea.hbm %s3408_s3, 192 }
  0x35   :  { %s51_s26 = sshll.u32 %s3055_s25, 4  ;;  %p2999_p10 = scmp.ne.s32.totalorder %s3408_s3, %s2998_s29  ;;  %s52_s26 = int_to_ptr.vmem [resolvable:$true] %s51_s26 }
  0x36   :  { %p3002_p11 = scmp.lt.u32.totalorder %s2998_s29, %s3408_s3 }
  0x38   :  { %p3004_p12 = pnand %p3002_p11, %p2999_p10 }
  0x3a   :  { %3007 = shalt.err (!%p3004_p12)
}
  0x3b   :  { %s3008_s8 = scalar_lea.vmem %s52_s26, 192  ;;  %p3013_p0 = scmp.lt.s32.totalorder %s52_s26, %s52_s26 }
  0x3c   :  { %p3009_p13 = scmp.ne.s32.totalorder %s52_s26, %s3008_s8  ;;  %p3014_p1 = scmp.lt.s32.totalorder %s3008_s8, %s3008_s8 }
  0x3e   :  { %p3015_p2 = por %p3014_p1, %p3013_p0 }
  0x40   :  { %p3016_p3 = pnand %p3015_p2, %p3009_p13 }
  0x42   :  { %3019 = shalt.err (!%p3016_p3)
}
  0x43   :  { %54 = dma.hbm_to_vmem [thread:$0]  %s3408_s3, 192, %s52_s26, [#allocation9]  }
  0x44   :  { %3042 = dma.done.wait [#allocation3], 32  }
  0x45   :  { %3043 = vsyncadd [#allocation3], 4294967264 }
  0x46   :  { %3044 = dma.done.wait [#allocation6], 4288  }
  0x47   :  { %3045 = vsyncadd [#allocation6], 4294963008 }
  0x48   :  { %3046 = dma.done.wait [#allocation9], 192  }
  0x49   :  { %3047 = vsyncadd [#allocation9], 4294967104  ;;  %v3056_v0 = vmov 0.0   ;;  %vm3057_vm0 = vmmov 0   ;;  %vm82_vm1 = vcmask 1044480   ;;  %vm78_vm2 = vcmask 39936  }
  0x4a   :  { %2795 = vmatprep.subr.mxu0 %v3056_v0  ;;  %2797 = vmatprep.mubr.msk.f32.mxu0 %vm3057_vm0, %v3056_v0  ;;  %v68_v1 = vld [vmem:[#allocation7] sm:$0xff]  ;;  %v67_v2 = vld [vmem:[#allocation2] sm:$0x3]  ;;  %v74_v3 = vlaneseq  ;;  %s3058_s3 = smov 123   ;;  %vm234_vm3 = vcmask 9216   ;;  %s3059_s10 = smov 118  }
  0x4b   :  { %2800 = vmatprep.subr.mxu1 %v3056_v0  ;;  %2802 = vmatprep.mubr.msk.f32.mxu1 %vm3057_vm0, %v3056_v0  ;;  %v3153_v6 = vld [vmem:[#allocation7 + $0x20] sm:$0xff]  ;;  %v331_v21 = vrot.slane %v68_v1, 5  ;;  %v3166_v22 = vld [vmem:[#allocation7 + $0x10] sm:$0xff]  ;;  %vm330_vm4 = vcmask 1042432   ;;  %vm252_vm5 = vcmask 1041408   ;;  %vm248_vm6 = vcmask 15360  }
  0x4c   :  { %2796 = vmatpush3.msk.msra.mxu0 %vm82_vm1, %v68_v1  ;;  %v3148_v4 = vshrl.u32 %v74_v3, 7  ;;  %v332_v23 = vrot.slane %v3166_v22, 5  ;;  %vm410_vm7 = vcmask 33792   ;;  %v70_v43 = vld [vmem:[#allocation7 + $0x18] sm:$0xff]  ;;  %v444_v44 = vrot.slane %v3166_v22, 2  ;;  %v73_v50 = vld [vmem:[#allocation7 + $0x30] sm:$0xff] }
  0x4d   :  { %2798 = vmatmul.mubr.msk.f32.vlgmr.msra.gmra.mrb[0].mxu0 %vm78_vm2, %v67_v2  ;;  %2805 = vmatprep.subr.mxu0 %v3056_v0  ;;  %v445_v45 = vrot.slane %v70_v43, 2  ;;  %v72_v58 = vld [vmem:[#allocation7 + $0x28] sm:$0xff]  ;;  %v536_v60 = vrot.slane %v70_v43, 7  ;;  %vm532_vm8 = vcmask 1040384   ;;  %v533_v61 = vrot.slane %v3166_v22, 7  ;;  %s3063_s1 = smov [#allocation10]  }
  0x4e   :  { %2807 = vmatprep.mubr.msk.f32.mxu0 %vm3057_vm0, %v3056_v0  ;;  %v3151_v5 = vsub.s32 4, %v3148_v4  ;;  %v333_v24 = vsel %vm330_vm4, %v331_v21, %v332_v23  ;;  %v3176_v31 = vsub.s32 5, %v3148_v4  ;;  %v3187_v49 = vsub.s32 0, %v3148_v4  ;;  %s2702_s11 = sshll.u32 %s3063_s1, 4  ;;  %s2703_s11 = int_to_ptr.vmem [resolvable:$true] %s2702_s11 }
  0x4f   :  { %v3190_v51 = vsub.s32 1, %v3148_v4  ;;  %v537_v59 = vrot.slane %v72_v58, 7  ;;  %v534_v62 = vrot.slane %v3153_v6, 7  ;;  %vm2694_vm9 = vcmask 8192   ;;  %s3020_s12 = scalar_lea.vmem %s2703_s11, 16  ;;  %s3024_s13 = scalar_lea.vmem %s2703_s11, 32 }
  0x50   :  { %v77_v7 = vrot.slane %v3153_v6, %v3151_v5  ;;  %v328_v32 = vrot.slane %v3153_v6, %v3176_v31  ;;  %v428_v52 = vrot.slane %v73_v50, %v3187_v49  ;;  %p3021_p4 = scmp.ne.s32.totalorder %s2703_s11, %s3020_s12  ;;  %p3025_p5 = scmp.lt.s32.totalorder %s2703_s11, %s2703_s11 }
  0x51   :  { %v433_v55 = vrot.slane %v73_v50, %v3190_v51  ;;  %v538_v63 = vsel %vm532_vm8, %v536_v60, %v537_v59  ;;  %v535_v1 = vsel %vm532_vm8, %v533_v61, %v534_v62  ;;  %p3026_p6 = scmp.lt.s32.totalorder %s3024_s13, %s3020_s12 }
  0x53   :  { %p3027_p7 = por %p3026_p6, %p3025_p5 }
  0x55   :  { %p3028_p8 = pnand %p3027_p7, %p3021_p4 }
 0x120   :  { %v152_v8 = vpop.f32.mrb[0].mxu0 }
 0x121   :  { %v153_v9 = vadd.f32 %v152_v8, %v77_v7  ;;  %v2799_v10 = vpop.f32.mrb[1].mxu0 }
 0x123   :  { %157 = vrot.lane.b32.xlu0 %v153_v9, %s3058_s3 }
 0x195   :  { %v158_v11 = vpop.permute.xlu0 %157 }
 0x196   :  { %2801 = vmatpush3.xpose.msk.msra.mxu1 %vm78_vm2, %v158_v11 }
 0x197   :  { %2810 = vmatprep.subr.mxu1 %v3056_v0 }
 0x199   :  { %2803 = vmatmul.mubr.msk.f32.vlgmr.msra.gmra.mrb[0].mxu1 %vm78_vm2, %v153_v9 }
 0x19a   :  { %2812 = vmatprep.mubr.msk.f32.mxu1 %vm3057_vm0, %v3056_v0  ;;  %2811 = vmatpush3.msk.msra.mxu1 %vm82_vm1, %v333_v24 }
 0x19b   :  { %541 = vmatprep.subr.mxu1 %v538_v63 }
 0x26c   :  { %v229_v12 = vpop.f32.mrb[0].mxu1 }
 0x26d   :  { %v233_v13 = vmul.f32 0.4472136, %v229_v12  ;;  %v2804_v14 = vpop.f32.mrb[1].mxu1 }
 0x26e   :  { %v3211_v14 = vsub.s32 7, %v3148_v4 }
 0x26f   :  { %v235_v15 = vsel %vm234_vm3, %v233_v13, -inf }
 0x270   :  { %236 = vmax.xlane.f32.xlu0 %v235_v15  ;;  %v529_v15 = vrot.slane %v3153_v6, %v3211_v14 }
 0x2fd   :  { %v237_v16 = vpop.xlane.xlu0 %236 }
 0x2fe   :  { %v238_v17 = vsub.f32 %v233_v13, %v237_v16 }
 0x300   :  { %v239_v18 = vmul.f32 1.442695, %v238_v17 }
 0x302   :  { %2896 = vpow2.f32 %v239_v18 }
 0x30c   :  { %v2897_v19 = vpop.eup %2896 }
 0x30d   :  { %v241_v20 = vsel %vm234_vm3, %v2897_v19, 0.0 }
 0x30e   :  { %242 = vadd.xlane.f32.xlu1 %v241_v20 }
 0x31f   :  { %246 = vrot.lane.b32.xlu1 %v153_v9, %s3059_s10 }
 0x39b   :  { %v243_v25 = vpop.xlane.xlu1 %242 }
 0x39c   :  { %2898 = vrcp.f32 %v243_v25 }
 0x39f   :  { %v247_v26 = vpop.permute.xlu1 %246 }
 0x3a0   :  { %2806 = vmatpush3.msk.msra.mxu0 %vm252_vm5, %v247_v26  ;;  %v636_v26 = vld [vmem:[#allocation7 + $0x40] sm:$0xff] }
 0x3a1   :  { %2721 = vmatprep.subr.msk.mxu0 %vm82_vm1, %v445_v45 }
 0x3a6   :  { %v2899_v27 = vpop.eup %2898 }
 0x3a7   :  { %v245_v28 = vmul.f32 %v2899_v27, %v2897_v19 }
 0x3a9   :  { %2808 = vmatmul.mubr.msk.f32.vlgmr.msra.gmra.mrb[2].mxu0 %vm248_vm6, %v245_v28 }
 0x3aa   :  { %517 = vmatprep.mubr.f32.mxu0 %v3056_v0  ;;  %2722 = vmatpush1.msk.msra.mxu0 %vm82_vm1, %v444_v44 }
 0x3ab   :  { %2815 = vmatprep.subr.mxu0 %v3056_v0 }
 0x47c   :  { %v321_v29 = vpop.f32.mrb[2].mxu0 }
 0x47d   :  { %v2809_v30 = vpop.f32.mrb[3].mxu0  ;;  %2813 = vmatmul.mubr.msk.f32.vlgmr.msra.gmra.mrb[2].mxu1 %vm78_vm2, %v321_v29  ;;  %v3220_v29 = vsub.s32 2, %v3148_v4 }
 0x47e   :  { %542 = vmatpush1.xpose.msra.mxu1 %v535_v1  ;;  %v3223_v30 = vsub.s32 3, %v3148_v4 }
 0x47f   :  { %2820 = vmatprep.subr.mxu1 %v3056_v0 }
 0x550   :  { %v405_v33 = vpop.f32.mrb[2].mxu1 }
 0x551   :  { %v406_v34 = vadd.f32 %v405_v33, %v328_v32  ;;  %v2814_v35 = vpop.f32.mrb[3].mxu1  ;;  %v628_v32 = vrot.slane %v73_v50, %v3220_v29 }
 0x552   :  { %v633_v35 = vrot.slane %v73_v50, %v3223_v30 }
 0x553   :  { %v409_v36 = vadd.f32 %v406_v34, %v67_v2  ;;  %v3203_v2 = vsub.s32 6, %v3148_v4 }
 0x555   :  { %v411_v37 = vsel %vm410_vm7, %v409_v36, 0.0  ;;  %v438_v3 = vrot.slane %v3153_v6, %v3203_v2  ;;  %v442_v7 = vrot.slane %v72_v58, %v3203_v2 }
 0x556   :  { %412 = vadd.xlane.f32.xlu1 %v411_v37 }
 0x5e3   :  { %v413_v38 = vpop.xlane.xlu1 %412 }
 0x5e4   :  { %v415_v39 = vmul.f32 0.2, %v413_v38  ;;  %v3230_v38 = vld [vmem:[#allocation7 + $0x60] sm:$0xff] }
 0x5e6   :  { %v416_v40 = vsub.f32 %v409_v36, %v415_v39  ;;  %v645_v39 = vrot.slane %v3230_v38, %v3151_v5 }
 0x5e8   :  { %v417_v41 = vmul.f32 %v416_v40, %v416_v40 }
 0x5ea   :  { %v418_v42 = vsel %vm410_vm7, %v417_v41, 0.0 }
 0x5eb   :  { %419 = vadd.xlane.f32.xlu0 %v418_v42 }
 0x678   :  { %v420_v46 = vpop.xlane.xlu0 %419 }
 0x679   :  { %v421_v47 = vmul.f32 0.2, %v420_v46 }
 0x67b   :  { %v422_v48 = vadd.f32 1e-05, %v421_v47 }
 0x67d   :  { %2900 = vrsqrt.f32 %v422_v48 }
 0x687   :  { %v2901_v53 = vpop.eup %2900 }
 0x688   :  { %v424_v54 = vmul.f32 %v2901_v53, %v416_v40 }
 0x68a   :  { %v429_v56 = vmul.f32 %v428_v52, %v424_v54 }
 0x68c   :  { %v434_v57 = vadd.f32 %v433_v55, %v429_v56  ;;  %v893_v55 = vrot.slane %v636_v26, 5  ;;  %v637_v56 = vld [vmem:[#allocation7 + $0x50] sm:$0xff] }
 0x68e   :  { %2723 = vmatmul.mubr.msk.f32.vlgmr.msra.gmra.mrb[4].mxu0 %vm78_vm2, %v434_v57 }
 0x68f   :  { %2817 = vmatprep.mubr.msk.f32.mxu0 %vm3057_vm0, %v3056_v0  ;;  %2816 = vmatpush3.msk.msra.mxu0 %vm82_vm1, %v636_v26 }
 0x690   :  { %2825 = vmatprep.subr.mxu0 %v3056_v0 }
 0x761   :  { %v519_v8 = vpop.f32.mrb[4].mxu0 }
 0x762   :  { %v520_v9 = vadd.f32 %v519_v8, %v438_v3  ;;  %v521_v10 = vpop.f32.mrb[5].mxu0  ;;  %v891_v3 = vrot.slane %v3230_v38, %v3176_v31 }
 0x763   :  { %v522_v11 = vadd.f32 %v521_v10, %v442_v7 }
 0x764   :  { %v524_v13 = vmax.f32 %v520_v9, 0.0 }
 0x765   :  { %v525_v12 = vmax.f32 %v522_v11, 0.0 }
 0x767   :  { %605 = vmatprep.mubr.f32.mxu1 %v525_v12 }
 0x768   :  { %606 = vmatmul.mubr.f32.vlgmr.msra.gmra.mrb[4].mxu1 %v524_v13 }
 0x769   :  { %2822 = vmatprep.mubr.msk.f32.mxu1 %vm3057_vm0, %v3056_v0 }
 0x83b   :  { %v607_v16 = vpop.f32.mrb[4].mxu1 }
 0x83c   :  { %v608_v17 = vadd.f32 %v607_v16, %v529_v15  ;;  %v609_v18 = vpop.f32.mrb[5].mxu1 }
 0x83d   :  { %v638_v18 = vld [vmem:[#allocation7 + $0x58] sm:$0xff] }
 0x83e   :  { %v611_v19 = vadd.f32 %v608_v17, %v434_v57  ;;  %v894_v57 = vrot.slane %v637_v56, 5 }
 0x840   :  { %v612_v20 = vsel %vm410_vm7, %v611_v19, 0.0  ;;  %v895_v58 = vsel %vm330_vm4, %v893_v55, %v894_v57 }
 0x841   :  { %613 = vadd.xlane.f32.xlu0 %v612_v20  ;;  %v1005_v20 = vrot.slane %v638_v18, 2 }
 0x8ce   :  { %v614_v21 = vpop.xlane.xlu0 %613 }
 0x8cf   :  { %v615_v22 = vmul.f32 0.2, %v614_v21 }
 0x8d1   :  { %v616_v23 = vsub.f32 %v611_v19, %v615_v22  ;;  %v1004_v19 = vrot.slane %v637_v56, 2 }
 0x8d3   :  { %v617_v24 = vmul.f32 %v616_v23, %v616_v23 }
 0x8d5   :  { %v618_v25 = vsel %vm410_vm7, %v617_v24, 0.0  ;;  %v641_v24 = vld [vmem:[#allocation7 + $0x70] sm:$0xff] }
 0x8d6   :  { %619 = vadd.xlane.f32.xlu0 %v618_v25  ;;  %v988_v25 = vrot.slane %v641_v24, %v3187_v49 }
 0x963   :  { %v620_v6 = vpop.xlane.xlu0 %619 }
 0x964   :  { %v621_v27 = vmul.f32 0.2, %v620_v6 }
 0x966   :  { %v622_v28 = vadd.f32 1e-05, %v621_v27  ;;  %v993_v27 = vrot.slane %v641_v24, %v3190_v51 }
 0x968   :  { %2902 = vrsqrt.f32 %v622_v28 }
 0x972   :  { %v2903_v33 = vpop.eup %2902 }
 0x973   :  { %v624_v34 = vmul.f32 %v2903_v33, %v616_v23  ;;  %v640_v33 = vld [vmem:[#allocation7 + $0x68] sm:$0xff] }
 0x975   :  { %v629_v36 = vmul.f32 %v628_v32, %v624_v34  ;;  %v1096_v34 = vrot.slane %v640_v33, 7 }
 0x977   :  { %v634_v37 = vadd.f32 %v633_v35, %v629_v36  ;;  %v1095_v35 = vrot.slane %v638_v18, 7  ;;  %v1092_v36 = vrot.slane %v637_v56, 7 }
 0x979   :  { %2818 = vmatmul.mubr.msk.f32.vlgmr.msra.gmra.mrb[6].mxu0 %vm78_vm2, %v634_v37 }
 0x97a   :  { %2827 = vmatprep.mubr.msk.f32.mxu0 %vm3057_vm0, %v3056_v0 }
 0xa4c   :  { %v718_v40 = vpop.f32.mrb[6].mxu0 }
 0xa4d   :  { %v719_v41 = vadd.f32 %v718_v40, %v645_v39  ;;  %v2819_v42 = vpop.f32.mrb[7].mxu0  ;;  %v1097_v39 = vsel %vm532_vm8, %v1095_v35, %v1096_v34 }
 0xa4e   :  { %v1002_v42 = vrot.slane %v640_v33, %v3203_v2 }
 0xa4f   :  { %723 = vrot.lane.b32.xlu0 %v719_v41, %s3058_s3 }
 0xac1   :  { %v724_v43 = vpop.permute.xlu0 %723 }
 0xac2   :  { %2821 = vmatpush3.xpose.msk.msra.mxu1 %vm78_vm2, %v724_v43 }
 0xac3   :  { %2830 = vmatprep.subr.mxu1 %v3056_v0 }
 0xac5   :  { %2823 = vmatmul.mubr.msk.f32.vlgmr.msra.gmra.mrb[6].mxu1 %vm78_vm2, %v719_v41 }
 0xac6   :  { %2832 = vmatprep.mubr.msk.f32.mxu1 %vm3057_vm0, %v3056_v0  ;;  %2831 = vmatpush3.msk.msra.mxu1 %vm82_vm1, %v895_v58 }
 0xac7   :  { %1100 = vmatprep.subr.mxu1 %v1097_v39 }
 0xb98   :  { %v795_v44 = vpop.f32.mrb[6].mxu1 }
 0xb99   :  { %v799_v45 = vmul.f32 0.4472136, %v795_v44  ;;  %v2824_v46 = vpop.f32.mrb[7].mxu1 }
 0xb9b   :  { %v800_v47 = vsel %vm234_vm3, %v799_v45, -inf }
 0xb9c   :  { %801 = vmax.xlane.f32.xlu1 %v800_v47 }
 0xc29   :  { %v802_v48 = vpop.xlane.xlu1 %801 }
 0xc2a   :  { %v803_v50 = vsub.f32 %v799_v45, %v802_v48 }
 0xc2c   :  { %v804_v52 = vmul.f32 1.442695, %v803_v50  ;;  %v1089_v50 = vrot.slane %v3230_v38, %v3211_v14 }
 0xc2e   :  { %2904 = vpow2.f32 %v804_v52 }
 0xc38   :  { %v2905_v53 = vpop.eup %2904 }
 0xc39   :  { %v806_v54 = vsel %vm234_vm3, %v2905_v53, 0.0 }
 0xc3a   :  { %807 = vadd.xlane.f32.xlu1 %v806_v54 }
 0xc4b   :  { %811 = vrot.lane.b32.xlu1 %v719_v41, %s3059_s10  ;;  %v998_v41 = vrot.slane %v3230_v38, %v3203_v2 }
 0xcc7   :  { %v808_v59 = vpop.xlane.xlu1 %807 }
 0xcc8   :  { %2906 = vrcp.f32 %v808_v59 }
 0xccb   :  { %v812_v60 = vpop.permute.xlu1 %811 }
 0xccc   :  { %2826 = vmatpush3.msk.msra.mxu0 %vm252_vm5, %v812_v60 }
 0xccd   :  { %2732 = vmatprep.subr.msk.mxu0 %vm82_vm1, %v1005_v20 }
 0xcd2   :  { %v2907_v61 = vpop.eup %2906 }
 0xcd3   :  { %v810_v62 = vmul.f32 %v2907_v61, %v2905_v53 }
 0xcd5   :  { %2828 = vmatmul.mubr.msk.f32.vlgmr.msra.gmra.mrb[8].mxu0 %vm248_vm6, %v810_v62  ;;  %v1195_v62 = vld [vmem:[#allocation7 + $0x80] sm:$0xff] }
 0xcd6   :  { %1077 = vmatprep.mubr.f32.mxu0 %v3056_v0  ;;  %2733 = vmatpush1.msk.msra.mxu0 %vm82_vm1, %v1004_v19 }
 0xcd7   :  { %2835 = vmatprep.subr.mxu0 %v3056_v0 }
 0xda8   :  { %v884_v63 = vpop.f32.mrb[8].mxu0 }
 0xda9   :  { %v2829_v1 = vpop.f32.mrb[9].mxu0  ;;  %2833 = vmatmul.mubr.msk.f32.vlgmr.msra.gmra.mrb[8].mxu1 %vm78_vm2, %v884_v63 }
 0xe7c   :  { %v967_v7 = vpop.f32.mrb[8].mxu1 }
 0xe7d   :  { %v968_v8 = vadd.f32 %v967_v7, %v891_v3  ;;  %v2834_v9 = vpop.f32.mrb[9].mxu1  ;;  %v1187_v3 = vrot.slane %v641_v24, %v3220_v29 }
 0xe7e   :  { %v1192_v9 = vrot.slane %v641_v24, %v3223_v30 }
 0xe7f   :  { %v971_v10 = vadd.f32 %v968_v8, %v634_v37  ;;  %v1093_v37 = vrot.slane %v3230_v38, 7 }
 0xe81   :  { %v972_v11 = vsel %vm410_vm7, %v971_v10, 0.0  ;;  %v1094_v40 = vsel %vm532_vm8, %v1092_v36, %v1093_v37 }
 0xe82   :  { %973 = vadd.xlane.f32.xlu0 %v972_v11  ;;  %1101 = vmatpush1.xpose.msra.mxu1 %v1094_v40 }
 0xe83   :  { %2840 = vmatprep.subr.mxu1 %v3056_v0 }
 0xf0f   :  { %v974_v12 = vpop.xlane.xlu0 %973 }
 0xf10   :  { %v975_v13 = vmul.f32 0.2, %v974_v12  ;;  %v3281_v12 = vld [vmem:[#allocation7 + $0xa0] sm:$0xff] }
 0xf12   :  { %v976_v15 = vsub.f32 %v971_v10, %v975_v13  ;;  %v1204_v13 = vrot.slane %v3281_v12, %v3151_v5 }
 0xf14   :  { %v977_v16 = vmul.f32 %v976_v15, %v976_v15 }
 0xf16   :  { %v978_v17 = vsel %vm410_vm7, %v977_v16, 0.0 }
 0xf17   :  { %979 = vadd.xlane.f32.xlu1 %v978_v17 }
 0xfa4   :  { %v980_v21 = vpop.xlane.xlu1 %979 }
 0xfa5   :  { %v981_v22 = vmul.f32 0.2, %v980_v21 }
 0xfa7   :  { %v982_v23 = vadd.f32 1e-05, %v981_v22 }
 0xfa9   :  { %2908 = vrsqrt.f32 %v982_v23 }
 0xfb3   :  { %v2909_v26 = vpop.eup %2908 }
 0xfb4   :  { %v984_v6 = vmul.f32 %v2909_v26, %v976_v15 }
 0xfb6   :  { %v989_v28 = vmul.f32 %v988_v25, %v984_v6 }
 0xfb8   :  { %v994_v32 = vadd.f32 %v993_v27, %v989_v28  ;;  %v1452_v27 = vrot.slane %v1195_v62, 5  ;;  %v1196_v28 = vld [vmem:[#allocation7 + $0x90] sm:$0xff] }
 0xfba   :  { %2734 = vmatmul.mubr.msk.f32.vlgmr.msra.gmra.mrb[10].mxu0 %vm78_vm2, %v994_v32 }
 0xfbb   :  { %2837 = vmatprep.mubr.msk.f32.mxu0 %vm3057_vm0, %v3056_v0  ;;  %2836 = vmatpush3.msk.msra.mxu0 %vm82_vm1, %v1195_v62 }
 0xfbc   :  { %2845 = vmatprep.subr.mxu0 %v3056_v0 }
0x108d   :  { %v1079_v43 = vpop.f32.mrb[10].mxu0 }
0x108e   :  { %v1080_v44 = vadd.f32 %v1079_v43, %v998_v41  ;;  %v1081_v45 = vpop.f32.mrb[11].mxu0  ;;  %v1450_v41 = vrot.slane %v3281_v12, %v3176_v31 }
0x108f   :  { %v1082_v46 = vadd.f32 %v1081_v45, %v1002_v42 }
0x1090   :  { %v1084_v48 = vmax.f32 %v1080_v44, 0.0 }
0x1091   :  { %v1085_v47 = vmax.f32 %v1082_v46, 0.0 }
0x1093   :  { %1164 = vmatprep.mubr.f32.mxu1 %v1085_v47 }
0x1094   :  { %1165 = vmatmul.mubr.f32.vlgmr.msra.gmra.mrb[10].mxu1 %v1084_v48 }
0x1095   :  { %2842 = vmatprep.mubr.msk.f32.mxu1 %vm3057_vm0, %v3056_v0 }
0x1167   :  { %v1166_v52 = vpop.f32.mrb[10].mxu1 }
0x1168   :  { %v1167_v53 = vadd.f32 %v1166_v52, %v1089_v50  ;;  %v1168_v54 = vpop.f32.mrb[11].mxu1 }
0x1169   :  { %v1197_v54 = vld [vmem:[#allocation7 + $0x98] sm:$0xff] }
0x116a   :  { %v1170_v55 = vadd.f32 %v1167_v53, %v994_v32  ;;  %v1453_v32 = vrot.slane %v1196_v28, 5 }
0x116c   :  { %v1171_v56 = vsel %vm410_vm7, %v1170_v55, 0.0  ;;  %v1454_v33 = vsel %vm330_vm4, %v1452_v27, %v1453_v32 }
0x116d   :  { %1172 = vadd.xlane.f32.xlu0 %v1171_v56  ;;  %v1564_v56 = vrot.slane %v1197_v54, 2 }
0x11fa   :  { %v1173_v57 = vpop.xlane.xlu0 %1172 }
0x11fb   :  { %v1174_v58 = vmul.f32 0.2, %v1173_v57 }
0x11fd   :  { %v1175_v59 = vsub.f32 %v1170_v55, %v1174_v58  ;;  %v1563_v55 = vrot.slane %v1196_v28, 2 }
0x11ff   :  { %v1176_v60 = vmul.f32 %v1175_v59, %v1175_v59 }
0x1201   :  { %v1177_v61 = vsel %vm410_vm7, %v1176_v60, 0.0  ;;  %v1200_v60 = vld [vmem:[#allocation7 + $0xb0] sm:$0xff] }
0x1202   :  { %1178 = vadd.xlane.f32.xlu0 %v1177_v61  ;;  %v1547_v61 = vrot.slane %v1200_v60, %v3187_v49 }
0x128f   :  { %v1179_v38 = vpop.xlane.xlu0 %1178 }
0x1290   :  { %v1180_v63 = vmul.f32 0.2, %v1179_v38 }
0x1292   :  { %v1181_v1 = vadd.f32 1e-05, %v1180_v63  ;;  %v1552_v63 = vrot.slane %v1200_v60, %v3190_v51 }
0x1294   :  { %2910 = vrsqrt.f32 %v1181_v1 }
0x129e   :  { %v2911_v7 = vpop.eup %2910 }
0x129f   :  { %v1183_v8 = vmul.f32 %v2911_v7, %v1175_v59  ;;  %v1199_v7 = vld [vmem:[#allocation7 + $0xa8] sm:$0xff] }
0x12a1   :  { %v1188_v10 = vmul.f32 %v1187_v3, %v1183_v8  ;;  %v1655_v8 = vrot.slane %v1199_v7, 7 }
0x12a3   :  { %v1193_v11 = vadd.f32 %v1192_v9, %v1188_v10  ;;  %v1654_v9 = vrot.slane %v1197_v54, 7  ;;  %v1651_v10 = vrot.slane %v1196_v28, 7 }
0x12a5   :  { %2838 = vmatmul.mubr.msk.f32.vlgmr.msra.gmra.mrb[12].mxu0 %vm78_vm2, %v1193_v11 }
0x12a6   :  { %2847 = vmatprep.mubr.msk.f32.mxu0 %vm3057_vm0, %v3056_v0 }
0x1378   :  { %v1277_v15 = vpop.f32.mrb[12].mxu0 }
0x1379   :  { %v1278_v16 = vadd.f32 %v1277_v15, %v1204_v13  ;;  %v2839_v17 = vpop.f32.mrb[13].mxu0  ;;  %v1656_v13 = vsel %vm532_vm8, %v1654_v9, %v1655_v8 }
0x137a   :  { %v1561_v17 = vrot.slane %v1199_v7, %v3203_v2 }
0x137b   :  { %1282 = vrot.lane.b32.xlu0 %v1278_v16, %s3058_s3 }
0x13ed   :  { %v1283_v18 = vpop.permute.xlu0 %1282 }
0x13ee   :  { %2841 = vmatpush3.xpose.msk.msra.mxu1 %vm78_vm2, %v1283_v18 }
0x13ef   :  { %2850 = vmatprep.subr.mxu1 %v3056_v0 }
0x13f1   :  { %2843 = vmatmul.mubr.msk.f32.vlgmr.msra.gmra.mrb[12].mxu1 %vm78_vm2, %v1278_v16 }
0x13f2   :  { %2852 = vmatprep.mubr.msk.f32.mxu1 %vm3057_vm0, %v3056_v0  ;;  %2851 = vmatpush3.msk.msra.mxu1 %vm82_vm1, %v1454_v33 }
0x13f3   :  { %1659 = vmatprep.subr.mxu1 %v1656_v13 }
0x14c4   :  { %v1354_v19 = vpop.f32.mrb[12].mxu1 }
0x14c5   :  { %v1358_v20 = vmul.f32 0.4472136, %v1354_v19  ;;  %v2844_v21 = vpop.f32.mrb[13].mxu1 }
0x14c7   :  { %v1359_v22 = vsel %vm234_vm3, %v1358_v20, -inf }
0x14c8   :  { %1360 = vmax.xlane.f32.xlu1 %v1359_v22 }
0x1555   :  { %v1361_v23 = vpop.xlane.xlu1 %1360 }
0x1556   :  { %v1362_v24 = vsub.f32 %v1358_v20, %v1361_v23 }
0x1558   :  { %v1363_v25 = vmul.f32 1.442695, %v1362_v24  ;;  %v1648_v24 = vrot.slane %v3281_v12, %v3211_v14 }
0x155a   :  { %2912 = vpow2.f32 %v1363_v25 }
0x1564   :  { %v2913_v26 = vpop.eup %2912 }
0x1565   :  { %v1365_v6 = vsel %vm234_vm3, %v2913_v26, 0.0 }
0x1566   :  { %1366 = vadd.xlane.f32.xlu1 %v1365_v6 }
0x1577   :  { %1370 = vrot.lane.b32.xlu1 %v1278_v16, %s3059_s10  ;;  %v1557_v16 = vrot.slane %v3281_v12, %v3203_v2 }
0x15f3   :  { %v1367_v34 = vpop.xlane.xlu1 %1366 }
0x15f4   :  { %2914 = vrcp.f32 %v1367_v34 }
0x15f7   :  { %v1371_v35 = vpop.permute.xlu1 %1370 }
0x15f8   :  { %2846 = vmatpush3.msk.msra.mxu0 %vm252_vm5, %v1371_v35 }
0x15f9   :  { %2743 = vmatprep.subr.msk.mxu0 %vm82_vm1, %v1564_v56 }
0x15fe   :  { %v2915_v36 = vpop.eup %2914 }
0x15ff   :  { %v1369_v37 = vmul.f32 %v2915_v36, %v2913_v26 }
0x1601   :  { %2848 = vmatmul.mubr.msk.f32.vlgmr.msra.gmra.mrb[14].mxu0 %vm248_vm6, %v1369_v37  ;;  %v1754_v37 = vld [vmem:[#allocation7 + $0xc0] sm:$0xff] }
0x1602   :  { %1636 = vmatprep.mubr.f32.mxu0 %v3056_v0  ;;  %2744 = vmatpush1.msk.msra.mxu0 %vm82_vm1, %v1563_v55 }
0x1603   :  { %2855 = vmatprep.subr.mxu0 %v3056_v0 }
0x16d4   :  { %v1443_v39 = vpop.f32.mrb[14].mxu0 }
0x16d5   :  { %v2849_v40 = vpop.f32.mrb[15].mxu0  ;;  %2853 = vmatmul.mubr.msk.f32.vlgmr.msra.gmra.mrb[14].mxu1 %vm78_vm2, %v1443_v39 }
0x17a8   :  { %v1526_v42 = vpop.f32.mrb[14].mxu1 }
0x17a9   :  { %v1527_v43 = vadd.f32 %v1526_v42, %v1450_v41  ;;  %v2854_v44 = vpop.f32.mrb[15].mxu1  ;;  %v1746_v41 = vrot.slane %v1200_v60, %v3220_v29 }
0x17aa   :  { %v1751_v44 = vrot.slane %v1200_v60, %v3223_v30 }
0x17ab   :  { %v1530_v45 = vadd.f32 %v1527_v43, %v1193_v11  ;;  %v1652_v11 = vrot.slane %v3281_v12, 7 }
0x17ad   :  { %v1531_v46 = vsel %vm410_vm7, %v1530_v45, 0.0  ;;  %v1653_v15 = vsel %vm532_vm8, %v1651_v10, %v1652_v11 }
0x17ae   :  { %1532 = vadd.xlane.f32.xlu0 %v1531_v46  ;;  %1660 = vmatpush1.xpose.msra.mxu1 %v1653_v15 }
0x17af   :  { %2860 = vmatprep.subr.mxu1 %v3056_v0 }
0x183b   :  { %v1533_v47 = vpop.xlane.xlu0 %1532 }
0x183c   :  { %v1534_v48 = vmul.f32 0.2, %v1533_v47  ;;  %v3332_v47 = vld [vmem:[#allocation7 + $0xe0] sm:$0xff] }
0x183e   :  { %v1535_v50 = vsub.f32 %v1530_v45, %v1534_v48  ;;  %v1763_v48 = vrot.slane %v3332_v47, %v3151_v5 }
0x1840   :  { %v1536_v52 = vmul.f32 %v1535_v50, %v1535_v50 }
0x1842   :  { %v1537_v53 = vsel %vm410_vm7, %v1536_v52, 0.0 }
0x1843   :  { %1538 = vadd.xlane.f32.xlu1 %v1537_v53 }
0x18d0   :  { %v1539_v57 = vpop.xlane.xlu1 %1538 }
0x18d1   :  { %v1540_v58 = vmul.f32 0.2, %v1539_v57 }
0x18d3   :  { %v1541_v59 = vadd.f32 1e-05, %v1540_v58 }
0x18d5   :  { %2916 = vrsqrt.f32 %v1541_v59 }
0x18df   :  { %v2917_v62 = vpop.eup %2916 }
0x18e0   :  { %v1543_v38 = vmul.f32 %v2917_v62, %v1535_v50 }
0x18e2   :  { %v1548_v1 = vmul.f32 %v1547_v61, %v1543_v38 }
0x18e4   :  { %v1553_v3 = vadd.f32 %v1552_v63, %v1548_v1  ;;  %v2011_v63 = vrot.slane %v1754_v37, 5  ;;  %v1755_v1 = vld [vmem:[#allocation7 + $0xd0] sm:$0xff] }
0x18e6   :  { %2745 = vmatmul.mubr.msk.f32.vlgmr.msra.gmra.mrb[16].mxu0 %vm78_vm2, %v1553_v3 }
0x18e7   :  { %2857 = vmatprep.mubr.msk.f32.mxu0 %vm3057_vm0, %v3056_v0  ;;  %2856 = vmatpush3.msk.msra.mxu0 %vm82_vm1, %v1754_v37 }
0x18e8   :  { %2865 = vmatprep.subr.mxu0 %v3056_v0 }
0x19b9   :  { %v1638_v18 = vpop.f32.mrb[16].mxu0 }
0x19ba   :  { %v1639_v19 = vadd.f32 %v1638_v18, %v1557_v16  ;;  %v1640_v20 = vpop.f32.mrb[17].mxu0  ;;  %v2009_v16 = vrot.slane %v3332_v47, %v3176_v31 }
0x19bb   :  { %v1641_v21 = vadd.f32 %v1640_v20, %v1561_v17 }
0x19bc   :  { %v1643_v23 = vmax.f32 %v1639_v19, 0.0 }
0x19bd   :  { %v1644_v22 = vmax.f32 %v1641_v21, 0.0 }
0x19bf   :  { %1723 = vmatprep.mubr.f32.mxu1 %v1644_v22 }
0x19c0   :  { %1724 = vmatmul.mubr.f32.vlgmr.msra.gmra.mrb[16].mxu1 %v1643_v23 }
0x19c1   :  { %2862 = vmatprep.mubr.msk.f32.mxu1 %vm3057_vm0, %v3056_v0 }
0x1a93   :  { %v1725_v25 = vpop.f32.mrb[16].mxu1 }
0x1a94   :  { %v1726_v26 = vadd.f32 %v1725_v25, %v1648_v24  ;;  %v1727_v6 = vpop.f32.mrb[17].mxu1 }
0x1a95   :  { %v1756_v6 = vld [vmem:[#allocation7 + $0xd8] sm:$0xff] }
0x1a96   :  { %v1729_v27 = vadd.f32 %v1726_v26, %v1553_v3  ;;  %v2012_v3 = vrot.slane %v1755_v1, 5 }
0x1a98   :  { %v1730_v28 = vsel %vm410_vm7, %v1729_v27, 0.0  ;;  %v2013_v7 = vsel %vm330_vm4, %v2011_v63, %v2012_v3 }
0x1a99   :  { %1731 = vadd.xlane.f32.xlu0 %v1730_v28  ;;  %v2122_v28 = vrot.slane %v1755_v1, 2 }
0x1b26   :  { %v1732_v32 = vpop.xlane.xlu0 %1731 }
0x1b27   :  { %v1733_v33 = vmul.f32 0.2, %v1732_v32 }
0x1b29   :  { %v1734_v34 = vsub.f32 %v1729_v27, %v1733_v33  ;;  %v2123_v27 = vrot.slane %v1756_v6, 2 }
0x1b2b   :  { %v1735_v35 = vmul.f32 %v1734_v34, %v1734_v34 }
0x1b2d   :  { %v1736_v36 = vsel %vm410_vm7, %v1735_v35, 0.0 }
0x1b2e   :  { %1737 = vadd.xlane.f32.xlu0 %v1736_v36 }
0x1bbb   :  { %v1738_v12 = vpop.xlane.xlu0 %1737 }
0x1bbc   :  { %v1739_v39 = vmul.f32 0.2, %v1738_v12 }
0x1bbe   :  { %v1740_v40 = vadd.f32 1e-05, %v1739_v39 }
0x1bc0   :  { %2918 = vrsqrt.f32 %v1740_v40 }
0x1bca   :  { %v2919_v42 = vpop.eup %2918 }
0x1bcb   :  { %v1742_v43 = vmul.f32 %v2919_v42, %v1734_v34  ;;  %v3357_v34 = vld [vmem:[#allocation7 + $0xf0] sm:$0xff] }
0x1bcc   :  { %v2106_v35 = vrot.slane %v3357_v34, %v3187_v49  ;;  %v2111_v12 = vrot.slane %v3357_v34, %v3190_v51 }
0x1bcd   :  { %v1747_v45 = vmul.f32 %v1746_v41, %v1742_v43  ;;  %v1758_v41 = vld [vmem:[#allocation7 + $0xe8] sm:$0xff]  ;;  %v2213_v43 = vrot.slane %v1756_v6, 7 }
0x1bce   :  { %v2214_v42 = vrot.slane %v1758_v41, 7  ;;  %v2313_v6 = vld [vmem:[#allocation8 + $0x8] sm:$0xf] }
0x1bcf   :  { %v1752_v46 = vadd.f32 %v1751_v44, %v1747_v45  ;;  %v2210_v44 = vrot.slane %v1755_v1, 7  ;;  %v2211_v45 = vrot.slane %v3332_v47, 7 }
0x1bd1   :  { %2858 = vmatmul.mubr.msk.f32.vlgmr.msra.gmra.mrb[18].mxu0 %vm78_vm2, %v1752_v46 }
0x1bd2   :  { %2867 = vmatprep.mubr.msk.f32.mxu0 %vm3057_vm0, %v3056_v0 }
0x1ca4   :  { %v1836_v50 = vpop.f32.mrb[18].mxu0 }
0x1ca5   :  { %v1837_v52 = vadd.f32 %v1836_v50, %v1763_v48  ;;  %v2859_v53 = vpop.f32.mrb[19].mxu0  ;;  %v2212_v48 = vsel %vm532_vm8, %v2210_v44, %v2211_v45  ;;  %v2116_v50 = vrot.slane %v3332_v47, %v3203_v2 }
0x1ca7   :  { %1841 = vrot.lane.b32.xlu0 %v1837_v52, %s3058_s3 }
0x1d19   :  { %v1842_v54 = vpop.permute.xlu0 %1841 }
0x1d1a   :  { %2861 = vmatpush3.xpose.msk.msra.mxu1 %vm78_vm2, %v1842_v54 }
0x1d1b   :  { %2870 = vmatprep.subr.mxu1 %v3056_v0 }
0x1d1d   :  { %2863 = vmatmul.mubr.msk.f32.vlgmr.msra.gmra.mrb[18].mxu1 %vm78_vm2, %v1837_v52 }
0x1d1e   :  { %2872 = vmatprep.mubr.msk.f32.mxu1 %vm3057_vm0, %v3056_v0  ;;  %2871 = vmatpush3.msk.msra.mxu1 %vm82_vm1, %v2013_v7 }
0x1df0   :  { %v1913_v55 = vpop.f32.mrb[18].mxu1 }
0x1df1   :  { %v1917_v56 = vmul.f32 0.4472136, %v1913_v55  ;;  %v2864_v57 = vpop.f32.mrb[19].mxu1 }
0x1df3   :  { %v1918_v58 = vsel %vm234_vm3, %v1917_v56, -inf }
0x1df4   :  { %1919 = vmax.xlane.f32.xlu1 %v1918_v58 }
0x1e81   :  { %v1920_v59 = vpop.xlane.xlu1 %1919 }
0x1e82   :  { %v1921_v60 = vsub.f32 %v1917_v56, %v1920_v59  ;;  %v2207_v59 = vrot.slane %v3332_v47, %v3211_v14  ;;  %v2314_v14 = vld [vmem:[#allocation5] sm:$0xff] }
0x1e84   :  { %v1922_v61 = vmul.f32 1.442695, %v1921_v60 }
0x1e86   :  { %2920 = vpow2.f32 %v1922_v61 }
0x1e90   :  { %v2921_v62 = vpop.eup %2920 }
0x1e91   :  { %v1924_v38 = vsel %vm234_vm3, %v2921_v62, 0.0 }
0x1e92   :  { %1925 = vadd.xlane.f32.xlu1 %v1924_v38 }
0x1ea3   :  { %1929 = vrot.lane.b32.xlu1 %v1837_v52, %s3059_s10  ;;  %v2120_v52 = vrot.slane %v1758_v41, %v3203_v2 }
0x1f1f   :  { %v1926_v8 = vpop.xlane.xlu1 %1925 }
0x1f20   :  { %2922 = vrcp.f32 %v1926_v8 }
0x1f23   :  { %v1930_v9 = vpop.permute.xlu1 %1929 }
0x1f24   :  { %2866 = vmatpush3.msk.msra.mxu0 %vm252_vm5, %v1930_v9 }
0x1f25   :  { %2754 = vmatprep.subr.msk.mxu0 %vm82_vm1, %v2123_v27  ;;  %v2337_v27 = vrot.slane %v2313_v6, %v3187_v49 }
0x1f2a   :  { %v2923_v10 = vpop.eup %2922 }
0x1f2b   :  { %v1928_v11 = vmul.f32 %v2923_v10, %v2921_v62  ;;  %v3060_v10 = vmov 1983009808  }
0x1f2d   :  { %2868 = vmatmul.mubr.msk.f32.vlgmr.msra.gmra.mrb[20].mxu0 %vm248_vm6, %v1928_v11  ;;  %v2352_v11 = vunpack.c.l.s4 %v3060_v10 }
0x1f2e   :  { %2195 = vmatprep.mubr.f32.mxu0 %v3056_v0  ;;  %2755 = vmatpush1.msk.msra.mxu0 %vm82_vm1, %v2122_v28  ;;  %v2341_v28 = vrot.slane %v2313_v6, %v3220_v29 }
0x2000   :  { %v2002_v13 = vpop.f32.mrb[20].mxu0 }
0x2001   :  { %v2869_v15 = vpop.f32.mrb[21].mxu0  ;;  %2873 = vmatmul.mubr.msk.f32.vlgmr.msra.gmra.mrb[20].mxu1 %vm78_vm2, %v2002_v13  ;;  %v2353_v13 = vunpack.c.0.s8 %v2352_v11 }
0x2003   :  { %v2356_v15 = vsub.s32 %v2353_v13, %v3148_v4 }
0x2005   :  { %v2357_v47 = vrot.slane %v2314_v14, %v2356_v15 }
0x20d4   :  { %v2085_v17 = vpop.f32.mrb[20].mxu1 }
0x20d5   :  { %v2086_v18 = vadd.f32 %v2085_v17, %v2009_v16  ;;  %v2874_v19 = vpop.f32.mrb[21].mxu1  ;;  %v2350_v16 = vcombine.high %v2314_v14, %v2314_v14  ;;  %v2365_v17 = vcombine.high %v2357_v47, %v2357_v47 }
0x20d7   :  { %v2089_v20 = vadd.f32 %v2086_v18, %v1752_v46  ;;  %v2215_v46 = vsel %vm532_vm8, %v2213_v43, %v2214_v42  ;;  %v2364_v18 = vrot.slane %v2350_v16, %v2356_v15  ;;  %2381 = vmatprep.subr.mxu0 %v2365_v17 }
0x20d8   :  { %2218 = vmatprep.subr.mxu1 %v2215_v46  ;;  %v3062_v46 = vmov 269488144  }
0x20d9   :  { %v2090_v21 = vsel %vm410_vm7, %v2089_v20, 0.0  ;;  %2219 = vmatpush1.xpose.msra.mxu1 %v2212_v48  ;;  %v2366_v19 = vcombine.high %v2364_v18, %v2364_v18  ;;  %v2675_v48 = vunpack.c.l.s4 %v3062_v46 }
0x20da   :  { %2091 = vadd.xlane.f32.xlu0 %v2090_v21 }
0x20db   :  { %2451 = vmatprep.subr.mxu1 %v2366_v19 }
0x2167   :  { %v2092_v22 = vpop.xlane.xlu0 %2091 }
0x2168   :  { %v2093_v23 = vmul.f32 0.2, %v2092_v22  ;;  %v2757_v22 = vld.sshfl [vmem:[#allocation5 + $0x8] sm:$0x33 pattern:$0x76325410] }
0x216a   :  { %v2094_v24 = vsub.f32 %v2089_v20, %v2093_v23  ;;  %v2312_v20 = vld [vmem:[#allocation8] sm:$0xff] }
0x216b   :  { %v2325_v21 = vrot.slane %v2312_v20, %v3220_v29  ;;  %v2321_v23 = vrot.slane %v2312_v20, %v3187_v49  ;;  %v2305_v49 = vrot.slane %v3357_v34, %v3220_v29 }
0x216c   :  { %v2095_v25 = vmul.f32 %v2094_v24, %v2094_v24 }
0x216e   :  { %v2096_v26 = vsel %vm410_vm7, %v2095_v25, 0.0  ;;  %v2333_v25 = vrot.slane %v2312_v20, %v3203_v2  ;;  %v3061_v2 = vmov 5  }
0x216f   :  { %2097 = vadd.xlane.f32.xlu1 %v2096_v26  ;;  %v2329_v26 = vrot.slane %v2312_v20, %v3151_v5  ;;  %2894 = vset.pattern.permute.xlu0 %v3061_v2 }
0x21fc   :  { %v2098_v31 = vpop.xlane.xlu1 %2097 }
0x21fd   :  { %v2099_v32 = vmul.f32 0.2, %v2098_v31 }
0x21ff   :  { %v2100_v33 = vadd.f32 1e-05, %v2099_v32 }
0x2201   :  { %2924 = vrsqrt.f32 %v2100_v33 }
0x220b   :  { %v2925_v36 = vpop.eup %2924 }
0x220c   :  { %v2102_v37 = vmul.f32 %v2925_v36, %v2094_v24  ;;  %v2374_v24 = vcombine.high %v2757_v22, %v2757_v22  ;;  %v2310_v36 = vrot.slane %v3357_v34, %v3223_v30 }
0x220e   :  { %v2107_v39 = vmul.f32 %v2106_v35, %v2102_v37 }
0x2210   :  { %v2112_v40 = vadd.f32 %v2111_v12, %v2107_v39 }
0x2212   :  { %2756 = vmatmul.mubr.msk.f32.vlgmr.msra.gmra.mrb[22].mxu0 %vm78_vm2, %v2112_v40 }
0x2213   :  { %2382 = vmatpush1.xpose.msra.mxu0 %v2357_v47  ;;  %2445 = vmatprep.mubr.f32.mxu0 %v2325_v21 }
0x2214   :  { %2521 = vmatprep.subr.mxu0 %v2374_v24 }
0x2216   :  { %2446 = vmatmul.mubr.f32.vlgmr.msra.gmra.mrb[24].mxu0 %v2321_v23 }
0x2217   :  { %2522 = vmatpush1.xpose.msra.mxu0 %v2757_v22  ;;  %2585 = vmatprep.mubr.f32.mxu0 %v2341_v28 }
0x221a   :  { %2586 = vmatmul.mubr.f32.vlgmr.msra.gmra.mrb[26].mxu0 %v2337_v27 }
0x22e5   :  { %v2197_v53 = vpop.f32.mrb[22].mxu0 }
0x22e6   :  { %v2198_v54 = vadd.f32 %v2197_v53, %v2116_v50  ;;  %v2199_v55 = vpop.f32.mrb[23].mxu0  ;;  %v2676_v50 = vunpack.c.0.s8 %v2675_v48 }
0x22e7   :  { %v2200_v56 = vadd.f32 %v2199_v55, %v2120_v52 }
0x22e8   :  { %v2202_v58 = vmax.f32 %v2198_v54, 0.0  ;;  %v2679_v30 = vsub.s32 %v2676_v50, %v3148_v4 }
0x22e9   :  { %v2203_v57 = vmax.f32 %v2200_v56, 0.0  ;;  %v2447_v39 = vpop.f32.mrb[24].mxu0 }
0x22eb   :  { %2282 = vmatprep.mubr.f32.mxu1 %v2203_v57 }
0x22ec   :  { %2283 = vmatmul.mubr.f32.vlgmr.msra.gmra.mrb[22].mxu1 %v2202_v58 }
0x22ed   :  { %2452 = vmatpush1.xpose.msra.mxu1 %v2364_v18  ;;  %2515 = vmatprep.mubr.f32.mxu1 %v2333_v25 }
0x22ee   :  { %2875 = vmatprep.subr.mxu1 %v3056_v0 }
0x22f0   :  { %2516 = vmatmul.mubr.f32.vlgmr.msra.gmra.mrb[24].mxu1 %v2329_v26 }
0x22f1   :  { %2877 = vmatprep.mubr.msk.f32.mxu1 %vm3057_vm0, %v3056_v0  ;;  %v2594_v0 = vrot.slane %v2312_v20, %v3190_v51 }
0x23bf   :  { %v2284_v60 = vpop.f32.mrb[22].mxu1 }
0x23c0   :  { %v2285_v61 = vadd.f32 %v2284_v60, %v2207_v59  ;;  %v2286_v62 = vpop.f32.mrb[23].mxu1 }
0x23c2   :  { %v2288_v38 = vadd.f32 %v2285_v61, %v2112_v40  ;;  %v2449_v40 = vpop.f32.mrb[25].mxu0 }
0x23c3   :  { %v2517_v41 = vpop.f32.mrb[24].mxu1  ;;  %v2587_v44 = vpop.f32.mrb[26].mxu0 }
0x23c4   :  { %v2289_v63 = vsel %vm410_vm7, %v2288_v38, 0.0  ;;  %v2518_v42 = vadd.f32 %v2517_v41, %v2447_v39  ;;  %v2519_v43 = vpop.f32.mrb[25].mxu1  ;;  %v2589_v45 = vpop.f32.mrb[27].mxu0 }
0x23c5   :  { %2290 = vadd.xlane.f32.xlu0 %v2289_v63 }
0x23c6   :  { %v2588_v29 = vadd.f32 %v2587_v44, %v2518_v42 }
0x2452   :  { %v2291_v1 = vpop.xlane.xlu0 %2290 }
0x2453   :  { %v2292_v3 = vmul.f32 0.2, %v2291_v1 }
0x2455   :  { %v2293_v7 = vsub.f32 %v2288_v38, %v2292_v3 }
0x2457   :  { %v2294_v8 = vmul.f32 %v2293_v7, %v2293_v7 }
0x2459   :  { %v2295_v9 = vsel %vm410_vm7, %v2294_v8, 0.0 }
0x245a   :  { %2296 = vadd.xlane.f32.xlu0 %v2295_v9 }
0x2470   :  { %2671 = vperm.xlu0 %2894, %v2312_v20  }
0x24e7   :  { %v2297_v5 = vpop.xlane.xlu0 %2296 }
0x24e8   :  { %v2298_v31 = vmul.f32 0.2, %v2297_v5 }
0x24ea   :  { %v2299_v32 = vadd.f32 1e-05, %v2298_v31 }
0x24ec   :  { %2926 = vrsqrt.f32 %v2299_v32 }
0x24ef   :  { %v2672_v34 = vpop.permute.xlu0 %2671 }
0x24f0   :  { %v2680_v52 = vrot.slane %v2672_v34, %v2679_v30 }
0x24f2   :  { %v2685_v53 = vrot.slane %v2680_v52, %v3190_v51 }
0x24f6   :  { %v2927_v33 = vpop.eup %2926 }
0x24f7   :  { %v2301_v35 = vmul.f32 %v2927_v33, %v2293_v7 }
0x24f9   :  { %v2306_v37 = vmul.f32 %v2305_v49, %v2301_v35 }
0x24fb   :  { %v2311_v12 = vadd.f32 %v2310_v36, %v2306_v37 }
0x24fd   :  { %2876 = vmatpush3.xpose.msk.msra.mxu1 %vm78_vm2, %v2311_v12 }
0x2500   :  { %2878 = vmatmul.mubr.msk.f32.vlgmr.msra.gmra.mrb[26].mxu1 %vm78_vm2, %v2594_v0 }
0x25d3   :  { %v2666_v54 = vpop.f32.mrb[26].mxu1 }
0x25d4   :  { %v2667_v55 = vadd.f32 %v2666_v54, %v2588_v29  ;;  %v2879_v56 = vpop.f32.mrb[27].mxu1 }
0x25d6   :  { %v2687_v57 = vadd.f32 %v2685_v53, %v2667_v55 }
0x25d8   :  { %v2760_v58 = vmul.f32 -1.442695, %v2687_v57 }
0x25da   :  { %2928 = vpow2.f32 %v2760_v58 }
0x25e4   :  { %v2929_v59 = vpop.eup %2928 }
0x25e5   :  { %v2691_v60 = vadd.f32 1.0, %v2929_v59 }
0x25e7   :  { %2930 = vrcp.f32 %v2691_v60 }
0x25f1   :  { %v2931_v61 = vpop.eup %2930 }
0x25f2   :  { %2695 = vst.msk [vmem:[#allocation10] sm:$0x1] %vm2694_vm9, %v2931_v61 }
0x25f3   :  { %3031 = shalt.err (!%p3028_p8)
}
0x25f4   :  { %s3032_s16 = scalar_lea.hbm %s3409_s4, 16 }
0x25f5   :  { %p3033_p9 = scmp.ne.s32.totalorder %s3409_s4, %s3032_s16  ;;  %p3036_p10 = scmp.lt.u32.totalorder %s3032_s16, %s3409_s4 }
0x25f7   :  { %p3038_p11 = pnand %p3036_p10, %p3033_p9 }
0x25f9   :  { %3041 = shalt.err (!%p3038_p11)
}
0x25fa   :  { %2705 = dma.vmem_to_hbm [thread:$0]  %s2703_s11, 16, %s3409_s4, [#allocation4]  }
0x25fb   :  { %3048 = dma.done.wait [#allocation4], 16  }
0x25fc   :  { %3049 = vsyncadd [#allocation4], 4294967280 }
0x25fd   :  { %2709 = vsyncpa [#allocation3], 1 }
0x25fe   :  { %2710 = vsyncpa [#allocation6], 1 }
0x25ff   :  { %2711 = vsyncpa [#allocation9], 1 }
0x2600   :  { %2712 = vsyncpa [#allocation4], 1 }

</bundles_post_ra>
